<compile_context>
chip_gen: v7x
topology: tpu7x:2x2x1
jax: 0.10.0
libtpu: 0.0.40
codegen_flags: <defaults>
</compile_context>

<pallas_src>
import jax
import jax.numpy as jnp
from jax import lax
from jax.experimental import pallas as pl
from jax.experimental.pallas import tpu as pltpu

H = 128        # n_hidden
FC1 = 150
FC2 = 28
FC1P = 256     # fc1 padded to lane-dense width
FC2P = 128     # fc2 output padded to one full lane group


# --------------------------------------------------------------------------
# Fused kernel: [input projection for all T] -> [T-step recurrence] -> [MLP head]
# --------------------------------------------------------------------------
def _make_fused_kernel(T, Bp):
    def kernel(x_ref, wih_ref, whh_ref, b_ref, w1_ref, b1_ref, w2_ref, b2_ref,
               out_ref, pg_sc, hout_sc):
        # --- prologue: hoisted input projection for every timestep at once ---
        # (T*Bp, D) @ (D, 4H) + (1, 4H)  ->  (T*Bp, 4H)
        pg_sc[...] = (
            jnp.dot(x_ref[...], wih_ref[...], preferred_element_type=jnp.float32)
            + b_ref[...]
        )

        whh = whh_ref[...]                       # (H, 4H), loaded once

        # --- recurrence: only h @ W_hh^T + elementwise on the serial path ---
        def step(t, carry):
            h, c = carry
            row = pl.multiple_of(t * Bp, Bp)     # sublane-aligned (Bp % 8 == 0)
            gates = (pg_sc[pl.ds(row, Bp), :]
                     + jnp.dot(h, whh, preferred_element_type=jnp.float32))
            i_g = jax.nn.sigmoid(gates[:, 0 * H:1 * H])
            f_g = jax.nn.sigmoid(gates[:, 1 * H:2 * H])
            g_g = jnp.tanh(gates[:, 2 * H:3 * H])
            o_g = jax.nn.sigmoid(gates[:, 3 * H:4 * H])
            c_new = f_g * c + i_g * g_g
            h_new = o_g * jnp.tanh(c_new)
            hout_sc[pl.ds(row, Bp), :] = h_new
            return h_new, c_new

        h0 = jnp.zeros((Bp, H), jnp.float32)
        c0 = jnp.zeros((Bp, H), jnp.float32)
        lax.fori_loop(0, T, step, (h0, c0), unroll=True)

        # --- MLP head (dropout = identity in eval mode), lane-dense padded ---
        h1 = (jnp.dot(hout_sc[...], w1_ref[...], preferred_element_type=jnp.float32)
              + b1_ref[...])
        h1 = jnp.maximum(h1, 0.0)
        out = (jnp.dot(h1, w2_ref[...], preferred_element_type=jnp.float32)
               + b2_ref[...])
        out_ref[...] = out.astype(out_ref.dtype)

    return kernel


def lstm_predictor_pallas(x, params):
    """x: (B, T, D) float32.  Returns logits (B, T, FC2)."""
    B, T, D = x.shape
    Bp = ((B + 7) // 8) * 8                               # batch padded to 8 sublanes

    # time-major, batch-padded, flattened to a (T*Bp, D) slab
    x_tbd = jnp.transpose(x, (1, 0, 2))                   # (T, B, D)
    x_pad = jnp.pad(x_tbd, ((0, 0), (0, Bp - B), (0, 0)))  # (T, Bp, D)
    x_flat = x_pad.reshape(T * Bp, D)

    wih_t = jnp.transpose(params["w_ih"])                 # (D, 4H)
    whh_t = jnp.transpose(params["w_hh"])                 # (H, 4H)
    bias = (params["b_ih"] + params["b_hh"]).reshape(1, 4 * H)

    # lane-dense zero-padded MLP weights
    w1_t = jnp.zeros((H, FC1P), jnp.float32).at[:, :FC1].set(jnp.transpose(params["w1"]))
    b1_p = jnp.zeros((1, FC1P), jnp.float32).at[:, :FC1].set(params["b1"])
    w2_t = jnp.zeros((FC1P, FC2P), jnp.float32).at[:FC1, :FC2].set(jnp.transpose(params["w2"]))
    b2_p = jnp.zeros((1, FC2P), jnp.float32).at[:, :FC2].set(params["b2"])

    out_flat = pl.pallas_call(
        _make_fused_kernel(T, Bp),
        out_shape=jax.ShapeDtypeStruct((T * Bp, FC2P), jnp.float32),
        grid_spec=pltpu.PrefetchScalarGridSpec(
            num_scalar_prefetch=0,
            grid=(1,),
            in_specs=[
                pl.BlockSpec((T * Bp, D), lambda i: (0, 0)),       # x (time-major, padded)
                pl.BlockSpec((D, 4 * H), lambda i: (0, 0)),        # W_ih^T
                pl.BlockSpec((H, 4 * H), lambda i: (0, 0)),        # W_hh^T
                pl.BlockSpec((1, 4 * H), lambda i: (0, 0)),        # bias
                pl.BlockSpec((H, FC1P), lambda i: (0, 0)),         # W1^T (padded)
                pl.BlockSpec((1, FC1P), lambda i: (0, 0)),         # b1   (padded)
                pl.BlockSpec((FC1P, FC2P), lambda i: (0, 0)),      # W2^T (padded)
                pl.BlockSpec((1, FC2P), lambda i: (0, 0)),         # b2   (padded)
            ],
            out_specs=pl.BlockSpec((T * Bp, FC2P), lambda i: (0, 0)),
            scratch_shapes=[
                pltpu.VMEM((T * Bp, 4 * H), jnp.float32),  # pre-gates
                pltpu.VMEM((T * Bp, H), jnp.float32),      # per-step hidden outputs
            ],
        ),
        compiler_params=pltpu.CompilerParams(
            dimension_semantics=("arbitrary",)),
    )(x_flat, wih_t, whh_t, bias, w1_t, b1_p, w2_t, b2_p)

    # (T*Bp, FC2P) -> (T, Bp, FC2P) -> slice padding -> batch-first (B, T, FC2)
    out = out_flat.reshape(T, Bp, FC2P)[:, :B, :FC2]
    return jnp.transpose(out, (1, 0, 2))


@jax.jit
def lstm_predictor_forward(x, params):
    return lstm_predictor_pallas(x, params)


# --------------------------------------------------------------------------
# Pure-JAX reference (matches PyTorch forward in eval mode) for validation.
# --------------------------------------------------------------------------
def reference_forward(x, params):
    B, T, D = x.shape
    wih_t = params["w_ih"].T
    whh_t = params["w_hh"].T
    bias = params["b_ih"] + params["b_hh"]

    def step(carry, x_t):
        h, c = carry
        gates = x_t @ wih_t + h @ whh_t + bias
        i_g = jax.nn.sigmoid(gates[:, 0 * H:1 * H])
        f_g = jax.nn.sigmoid(gates[:, 1 * H:2 * H])
        g_g = jnp.tanh(gates[:, 2 * H:3 * H])
        o_g = jax.nn.sigmoid(gates[:, 3 * H:4 * H])
        c_new = f_g * c + i_g * g_g
        h_new = o_g * jnp.tanh(c_new)
        return (h_new, c_new), h_new

    h0 = jnp.zeros((B, H), jnp.float32)
    c0 = jnp.zeros((B, H), jnp.float32)
    _, on_tbh = lax.scan(step, (h0, c0), jnp.transpose(x, (1, 0, 2)))
    on = jnp.transpose(on_tbh, (1, 0, 2))
    h1 = jnp.maximum(on @ params["w1"].T + params["b1"], 0.0)
    return h1 @ params["w2"].T + params["b2"]


def init_params(key, input_dim):
    ks = jax.random.split(key, 8)
    k_lstm = 1.0 / jnp.sqrt(H)
    k_fc1 = 1.0 / jnp.sqrt(H)
    k_fc2 = 1.0 / jnp.sqrt(FC1)
    u = lambda k, shape, bound: jax.random.uniform(
        k, shape, jnp.float32, -bound, bound)
    return {
        "w_ih": u(ks[0], (4 * H, input_dim), k_lstm),
        "w_hh": u(ks[1], (4 * H, H), k_lstm),
        "b_ih": u(ks[2], (4 * H,), k_lstm),
        "b_hh": u(ks[3], (4 * H,), k_lstm),
        "w1": u(ks[4], (FC1, H), k_fc1),
        "b1": u(ks[5], (FC1,), k_fc1),
        "w2": u(ks[6], (FC2, FC1), k_fc2),
        "b2": u(ks[7], (FC2,), k_fc2),
    }


if __name__ == "__main__":
    B, T, D = 2, 8, 16   # batch=2, seq=8, input_dim=16
    key = jax.random.PRNGKey(0)
    k_x, k_p = jax.random.split(key)
    x = jax.random.normal(k_x, (B, T, D), jnp.float32)
    params = init_params(k_p, D)

    out = lstm_predictor_forward(x, params)
    out = jax.block_until_ready(out)

    ref = reference_forward(x, params)
    assert out.shape == (B, T, FC2), out.shape
    assert jnp.allclose(out, ref, atol=1e-4, rtol=1e-4), \
        float(jnp.max(jnp.abs(out - ref)))

    print("KERNEL_OK")
</pallas_src>

<mosaic_0001>
module attributes {stable_mosaic.version = 11 : i64} {
  func.func @kernel(%arg0: i32, %arg1: memref<64x16xf32, #tpu.memory_space<vmem>>, %arg2: memref<16x512xf32, #tpu.memory_space<vmem>>, %arg3: memref<128x512xf32, #tpu.memory_space<vmem>>, %arg4: memref<1x512xf32, #tpu.memory_space<vmem>>, %arg5: memref<128x256xf32, #tpu.memory_space<vmem>>, %arg6: memref<1x256xf32, #tpu.memory_space<vmem>>, %arg7: memref<256x128xf32, #tpu.memory_space<vmem>>, %arg8: memref<1x128xf32, #tpu.memory_space<vmem>>, %arg9: memref<64x128xf32, #tpu.memory_space<vmem>>, %arg10: memref<64x512xf32, #tpu.memory_space<vmem>>, %arg11: memref<64x128xf32, #tpu.memory_space<vmem>>) attributes {dimension_semantics = [#tpu.dimension_semantics<arbitrary>], iteration_bounds = array<i64: 1>, scalar_prefetch = 0 : i64, scratch_operands = 2 : i64, tpu.core_type = #tpu.core_type<tc>, window_params = [{pipeline_mode = #tpu.pipeline_mode<synchronous>, transform_indices = @transform_0, window_bounds = array<i64: 64, 16>}, {pipeline_mode = #tpu.pipeline_mode<synchronous>, transform_indices = @transform_1, window_bounds = array<i64: 16, 512>}, {pipeline_mode = #tpu.pipeline_mode<synchronous>, transform_indices = @transform_2, window_bounds = array<i64: 128, 512>}, {pipeline_mode = #tpu.pipeline_mode<synchronous>, transform_indices = @transform_3, window_bounds = array<i64: 1, 512>}, {pipeline_mode = #tpu.pipeline_mode<synchronous>, transform_indices = @transform_4, window_bounds = array<i64: 128, 256>}, {pipeline_mode = #tpu.pipeline_mode<synchronous>, transform_indices = @transform_5, window_bounds = array<i64: 1, 256>}, {pipeline_mode = #tpu.pipeline_mode<synchronous>, transform_indices = @transform_6, window_bounds = array<i64: 256, 128>}, {pipeline_mode = #tpu.pipeline_mode<synchronous>, transform_indices = @transform_7, window_bounds = array<i64: 1, 128>}, {pipeline_mode = #tpu.pipeline_mode<synchronous>, transform_indices = @transform_8, window_bounds = array<i64: 64, 128>}]} {
    %c0 = arith.constant 0 : index
    %c0_0 = arith.constant 0 : index
    %0 = vector.load %arg1[%c0, %c0_0] : memref<64x16xf32, #tpu.memory_space<vmem>>, vector<64x16xf32>
    %c0_1 = arith.constant 0 : index
    %c0_2 = arith.constant 0 : index
    %1 = vector.load %arg2[%c0_1, %c0_2] : memref<16x512xf32, #tpu.memory_space<vmem>>, vector<16x512xf32>
    %cst = arith.constant dense<0.000000e+00> : vector<64x512xf32>
    %2 = tpu.matmul %0, %1, %cst {dimension_numbers = #tpu.dot_dimension_numbers<[1], [0], [0], [1], [0, 0, 1, 1], [], []>} : vector<64x16xf32>, vector<16x512xf32>, vector<64x512xf32> -> vector<64x512xf32>
    %c0_3 = arith.constant 0 : index
    %c0_4 = arith.constant 0 : index
    %3 = vector.load %arg4[%c0_3, %c0_4] : memref<1x512xf32, #tpu.memory_space<vmem>>, vector<1x512xf32>
    %4 = vector.broadcast %3 : vector<1x512xf32> to vector<64x512xf32>
    %5 = arith.addf %2, %4 : vector<64x512xf32>
    %c0_5 = arith.constant 0 : index
    %c0_6 = arith.constant 0 : index
    %6 = vector.load %arg10[%c0_5, %c0_6] : memref<64x512xf32, #tpu.memory_space<vmem>>, vector<64x512xf32>
    tpu.vector_store %arg10[%c0_5, %c0_6], %5 {strides = array<i32>} : memref<64x512xf32, #tpu.memory_space<vmem>>, vector<64x512xf32>,
    %c0_7 = arith.constant 0 : index
    %c0_8 = arith.constant 0 : index
    %7 = vector.load %arg3[%c0_7, %c0_8] : memref<128x512xf32, #tpu.memory_space<vmem>>, vector<128x512xf32>
    %cst_9 = arith.constant 0.000000e+00 : f32
    %8 = vector.broadcast %cst_9 : f32 to vector<8x128xf32>
    %cst_10 = arith.constant 0.000000e+00 : f32
    %9 = vector.broadcast %cst_10 : f32 to vector<8x128xf32>
    %c0_i32 = arith.constant 0 : i32
    %c8_i32 = arith.constant 8 : i32
    %10 = arith.muli %c0_i32, %c8_i32 : i32
    %11 = tpu.assume_multiple %10, 8 : i32
    %12 = arith.index_cast %11 : i32 to index
    %c0_11 = arith.constant 0 : index
    %13 = vector.load %arg10[%12, %c0_11] : memref<64x512xf32, #tpu.memory_space<vmem>>, vector<8x512xf32>
    %cst_12 = arith.constant dense<0.000000e+00> : vector<8x512xf32>
    %14 = tpu.matmul %8, %7, %cst_12 {dimension_numbers = #tpu.dot_dimension_numbers<[1], [0], [0], [1], [0, 0, 1, 1], [], []>} : vector<8x128xf32>, vector<128x512xf32>, vector<8x512xf32> -> vector<8x512xf32>
    %15 = arith.addf %13, %14 : vector<8x512xf32>
    %16 = vector.extract_strided_slice %15 {offsets = [0, 0], sizes = [8, 128], strides = [1, 1]} : vector<8x512xf32> to vector<8x128xf32>
    %17 = arith.negf %16 : vector<8x128xf32>
    %18 = math.exp %17 : vector<8x128xf32>
    %cst_13 = arith.constant 1.000000e+00 : f32
    %19 = vector.broadcast %cst_13 : f32 to vector<8x128xf32>
    %20 = arith.addf %19, %18 : vector<8x128xf32>
    %21 = arith.divf %19, %20 : vector<8x128xf32>
    %22 = vector.extract_strided_slice %15 {offsets = [0, 128], sizes = [8, 128], strides = [1, 1]} : vector<8x512xf32> to vector<8x128xf32>
    %23 = arith.negf %22 : vector<8x128xf32>
    %24 = math.exp %23 : vector<8x128xf32>
    %cst_14 = arith.constant 1.000000e+00 : f32
    %25 = vector.broadcast %cst_14 : f32 to vector<8x128xf32>
    %26 = arith.addf %25, %24 : vector<8x128xf32>
    %27 = arith.divf %25, %26 : vector<8x128xf32>
    %28 = vector.extract_strided_slice %15 {offsets = [0, 256], sizes = [8, 128], strides = [1, 1]} : vector<8x512xf32> to vector<8x128xf32>
    %29 = math.tanh %28 : vector<8x128xf32>
    %30 = vector.extract_strided_slice %15 {offsets = [0, 384], sizes = [8, 128], strides = [1, 1]} : vector<8x512xf32> to vector<8x128xf32>
    %31 = arith.negf %30 : vector<8x128xf32>
    %32 = math.exp %31 : vector<8x128xf32>
    %cst_15 = arith.constant 1.000000e+00 : f32
    %33 = vector.broadcast %cst_15 : f32 to vector<8x128xf32>
    %34 = arith.addf %33, %32 : vector<8x128xf32>
    %35 = arith.divf %33, %34 : vector<8x128xf32>
    %36 = arith.mulf %27, %9 : vector<8x128xf32>
    %37 = arith.mulf %21, %29 : vector<8x128xf32>
    %38 = arith.addf %36, %37 : vector<8x128xf32>
    %39 = math.tanh %38 : vector<8x128xf32>
    %40 = arith.mulf %35, %39 : vector<8x128xf32>
    %41 = arith.index_cast %11 : i32 to index
    %c0_16 = arith.constant 0 : index
    %42 = vector.load %arg11[%41, %c0_16] : memref<64x128xf32, #tpu.memory_space<vmem>>, vector<8x128xf32>
    tpu.vector_store %arg11[%41, %c0_16], %40 {strides = array<i32>} : memref<64x128xf32, #tpu.memory_space<vmem>>, vector<8x128xf32>,
    %c1_i32 = arith.constant 1 : i32
    %c8_i32_17 = arith.constant 8 : i32
    %43 = arith.muli %c1_i32, %c8_i32_17 : i32
    %44 = tpu.assume_multiple %43, 8 : i32
    %45 = arith.index_cast %44 : i32 to index
    %c0_18 = arith.constant 0 : index
    %46 = vector.load %arg10[%45, %c0_18] : memref<64x512xf32, #tpu.memory_space<vmem>>, vector<8x512xf32>
    %cst_19 = arith.constant dense<0.000000e+00> : vector<8x512xf32>
    %47 = tpu.matmul %40, %7, %cst_19 {dimension_numbers = #tpu.dot_dimension_numbers<[1], [0], [0], [1], [0, 0, 1, 1], [], []>} : vector<8x128xf32>, vector<128x512xf32>, vector<8x512xf32> -> vector<8x512xf32>
    %48 = arith.addf %46, %47 : vector<8x512xf32>
    %49 = vector.extract_strided_slice %48 {offsets = [0, 0], sizes = [8, 128], strides = [1, 1]} : vector<8x512xf32> to vector<8x128xf32>
    %50 = arith.negf %49 : vector<8x128xf32>
    %51 = math.exp %50 : vector<8x128xf32>
    %cst_20 = arith.constant 1.000000e+00 : f32
    %52 = vector.broadcast %cst_20 : f32 to vector<8x128xf32>
    %53 = arith.addf %52, %51 : vector<8x128xf32>
    %54 = arith.divf %52, %53 : vector<8x128xf32>
    %55 = vector.extract_strided_slice %48 {offsets = [0, 128], sizes = [8, 128], strides = [1, 1]} : vector<8x512xf32> to vector<8x128xf32>
    %56 = arith.negf %55 : vector<8x128xf32>
    %57 = math.exp %56 : vector<8x128xf32>
    %cst_21 = arith.constant 1.000000e+00 : f32
    %58 = vector.broadcast %cst_21 : f32 to vector<8x128xf32>
    %59 = arith.addf %58, %57 : vector<8x128xf32>
    %60 = arith.divf %58, %59 : vector<8x128xf32>
    %61 = vector.extract_strided_slice %48 {offsets = [0, 256], sizes = [8, 128], strides = [1, 1]} : vector<8x512xf32> to vector<8x128xf32>
    %62 = math.tanh %61 : vector<8x128xf32>
    %63 = vector.extract_strided_slice %48 {offsets = [0, 384], sizes = [8, 128], strides = [1, 1]} : vector<8x512xf32> to vector<8x128xf32>
    %64 = arith.negf %63 : vector<8x128xf32>
    %65 = math.exp %64 : vector<8x128xf32>
    %cst_22 = arith.constant 1.000000e+00 : f32
    %66 = vector.broadcast %cst_22 : f32 to vector<8x128xf32>
    %67 = arith.addf %66, %65 : vector<8x128xf32>
    %68 = arith.divf %66, %67 : vector<8x128xf32>
    %69 = arith.mulf %60, %38 : vector<8x128xf32>
    %70 = arith.mulf %54, %62 : vector<8x128xf32>
    %71 = arith.addf %69, %70 : vector<8x128xf32>
    %72 = math.tanh %71 : vector<8x128xf32>
    %73 = arith.mulf %68, %72 : vector<8x128xf32>
    %74 = arith.index_cast %44 : i32 to index
    %c0_23 = arith.constant 0 : index
    %75 = vector.load %arg11[%74, %c0_23] : memref<64x128xf32, #tpu.memory_space<vmem>>, vector<8x128xf32>
    tpu.vector_store %arg11[%74, %c0_23], %73 {strides = array<i32>} : memref<64x128xf32, #tpu.memory_space<vmem>>, vector<8x128xf32>,
    %c2_i32 = arith.constant 2 : i32
    %c8_i32_24 = arith.constant 8 : i32
    %76 = arith.muli %c2_i32, %c8_i32_24 : i32
    %77 = tpu.assume_multiple %76, 8 : i32
    %78 = arith.index_cast %77 : i32 to index
    %c0_25 = arith.constant 0 : index
    %79 = vector.load %arg10[%78, %c0_25] : memref<64x512xf32, #tpu.memory_space<vmem>>, vector<8x512xf32>
    %cst_26 = arith.constant dense<0.000000e+00> : vector<8x512xf32>
    %80 = tpu.matmul %73, %7, %cst_26 {dimension_numbers = #tpu.dot_dimension_numbers<[1], [0], [0], [1], [0, 0, 1, 1], [], []>} : vector<8x128xf32>, vector<128x512xf32>, vector<8x512xf32> -> vector<8x512xf32>
    %81 = arith.addf %79, %80 : vector<8x512xf32>
    %82 = vector.extract_strided_slice %81 {offsets = [0, 0], sizes = [8, 128], strides = [1, 1]} : vector<8x512xf32> to vector<8x128xf32>
    %83 = arith.negf %82 : vector<8x128xf32>
    %84 = math.exp %83 : vector<8x128xf32>
    %cst_27 = arith.constant 1.000000e+00 : f32
    %85 = vector.broadcast %cst_27 : f32 to vector<8x128xf32>
    %86 = arith.addf %85, %84 : vector<8x128xf32>
    %87 = arith.divf %85, %86 : vector<8x128xf32>
    %88 = vector.extract_strided_slice %81 {offsets = [0, 128], sizes = [8, 128], strides = [1, 1]} : vector<8x512xf32> to vector<8x128xf32>
    %89 = arith.negf %88 : vector<8x128xf32>
    %90 = math.exp %89 : vector<8x128xf32>
    %cst_28 = arith.constant 1.000000e+00 : f32
    %91 = vector.broadcast %cst_28 : f32 to vector<8x128xf32>
    %92 = arith.addf %91, %90 : vector<8x128xf32>
    %93 = arith.divf %91, %92 : vector<8x128xf32>
    %94 = vector.extract_strided_slice %81 {offsets = [0, 256], sizes = [8, 128], strides = [1, 1]} : vector<8x512xf32> to vector<8x128xf32>
    %95 = math.tanh %94 : vector<8x128xf32>
    %96 = vector.extract_strided_slice %81 {offsets = [0, 384], sizes = [8, 128], strides = [1, 1]} : vector<8x512xf32> to vector<8x128xf32>
    %97 = arith.negf %96 : vector<8x128xf32>
    %98 = math.exp %97 : vector<8x128xf32>
    %cst_29 = arith.constant 1.000000e+00 : f32
    %99 = vector.broadcast %cst_29 : f32 to vector<8x128xf32>
    %100 = arith.addf %99, %98 : vector<8x128xf32>
    %101 = arith.divf %99, %100 : vector<8x128xf32>
    %102 = arith.mulf %93, %71 : vector<8x128xf32>
    %103 = arith.mulf %87, %95 : vector<8x128xf32>
    %104 = arith.addf %102, %103 : vector<8x128xf32>
    %105 = math.tanh %104 : vector<8x128xf32>
    %106 = arith.mulf %101, %105 : vector<8x128xf32>
    %107 = arith.index_cast %77 : i32 to index
    %c0_30 = arith.constant 0 : index
    %108 = vector.load %arg11[%107, %c0_30] : memref<64x128xf32, #tpu.memory_space<vmem>>, vector<8x128xf32>
    tpu.vector_store %arg11[%107, %c0_30], %106 {strides = array<i32>} : memref<64x128xf32, #tpu.memory_space<vmem>>, vector<8x128xf32>,
    %c3_i32 = arith.constant 3 : i32
    %c8_i32_31 = arith.constant 8 : i32
    %109 = arith.muli %c3_i32, %c8_i32_31 : i32
    %110 = tpu.assume_multiple %109, 8 : i32
    %111 = arith.index_cast %110 : i32 to index
    %c0_32 = arith.constant 0 : index
    %112 = vector.load %arg10[%111, %c0_32] : memref<64x512xf32, #tpu.memory_space<vmem>>, vector<8x512xf32>
    %cst_33 = arith.constant dense<0.000000e+00> : vector<8x512xf32>
    %113 = tpu.matmul %106, %7, %cst_33 {dimension_numbers = #tpu.dot_dimension_numbers<[1], [0], [0], [1], [0, 0, 1, 1], [], []>} : vector<8x128xf32>, vector<128x512xf32>, vector<8x512xf32> -> vector<8x512xf32>
    %114 = arith.addf %112, %113 : vector<8x512xf32>
    %115 = vector.extract_strided_slice %114 {offsets = [0, 0], sizes = [8, 128], strides = [1, 1]} : vector<8x512xf32> to vector<8x128xf32>
    %116 = arith.negf %115 : vector<8x128xf32>
    %117 = math.exp %116 : vector<8x128xf32>
    %cst_34 = arith.constant 1.000000e+00 : f32
    %118 = vector.broadcast %cst_34 : f32 to vector<8x128xf32>
    %119 = arith.addf %118, %117 : vector<8x128xf32>
    %120 = arith.divf %118, %119 : vector<8x128xf32>
    %121 = vector.extract_strided_slice %114 {offsets = [0, 128], sizes = [8, 128], strides = [1, 1]} : vector<8x512xf32> to vector<8x128xf32>
    %122 = arith.negf %121 : vector<8x128xf32>
    %123 = math.exp %122 : vector<8x128xf32>
    %cst_35 = arith.constant 1.000000e+00 : f32
    %124 = vector.broadcast %cst_35 : f32 to vector<8x128xf32>
    %125 = arith.addf %124, %123 : vector<8x128xf32>
    %126 = arith.divf %124, %125 : vector<8x128xf32>
    %127 = vector.extract_strided_slice %114 {offsets = [0, 256], sizes = [8, 128], strides = [1, 1]} : vector<8x512xf32> to vector<8x128xf32>
    %128 = math.tanh %127 : vector<8x128xf32>
    %129 = vector.extract_strided_slice %114 {offsets = [0, 384], sizes = [8, 128], strides = [1, 1]} : vector<8x512xf32> to vector<8x128xf32>
    %130 = arith.negf %129 : vector<8x128xf32>
    %131 = math.exp %130 : vector<8x128xf32>
    %cst_36 = arith.constant 1.000000e+00 : f32
    %132 = vector.broadcast %cst_36 : f32 to vector<8x128xf32>
    %133 = arith.addf %132, %131 : vector<8x128xf32>
    %134 = arith.divf %132, %133 : vector<8x128xf32>
    %135 = arith.mulf %126, %104 : vector<8x128xf32>
    %136 = arith.mulf %120, %128 : vector<8x128xf32>
    %137 = arith.addf %135, %136 : vector<8x128xf32>
    %138 = math.tanh %137 : vector<8x128xf32>
    %139 = arith.mulf %134, %138 : vector<8x128xf32>
    %140 = arith.index_cast %110 : i32 to index
    %c0_37 = arith.constant 0 : index
    %141 = vector.load %arg11[%140, %c0_37] : memref<64x128xf32, #tpu.memory_space<vmem>>, vector<8x128xf32>
    tpu.vector_store %arg11[%140, %c0_37], %139 {strides = array<i32>} : memref<64x128xf32, #tpu.memory_space<vmem>>, vector<8x128xf32>,
    %c4_i32 = arith.constant 4 : i32
    %c8_i32_38 = arith.constant 8 : i32
    %142 = arith.muli %c4_i32, %c8_i32_38 : i32
    %143 = tpu.assume_multiple %142, 8 : i32
    %144 = arith.index_cast %143 : i32 to index
    %c0_39 = arith.constant 0 : index
    %145 = vector.load %arg10[%144, %c0_39] : memref<64x512xf32, #tpu.memory_space<vmem>>, vector<8x512xf32>
    %cst_40 = arith.constant dense<0.000000e+00> : vector<8x512xf32>
    %146 = tpu.matmul %139, %7, %cst_40 {dimension_numbers = #tpu.dot_dimension_numbers<[1], [0], [0], [1], [0, 0, 1, 1], [], []>} : vector<8x128xf32>, vector<128x512xf32>, vector<8x512xf32> -> vector<8x512xf32>
    %147 = arith.addf %145, %146 : vector<8x512xf32>
    %148 = vector.extract_strided_slice %147 {offsets = [0, 0], sizes = [8, 128], strides = [1, 1]} : vector<8x512xf32> to vector<8x128xf32>
    %149 = arith.negf %148 : vector<8x128xf32>
    %150 = math.exp %149 : vector<8x128xf32>
    %cst_41 = arith.constant 1.000000e+00 : f32
    %151 = vector.broadcast %cst_41 : f32 to vector<8x128xf32>
    %152 = arith.addf %151, %150 : vector<8x128xf32>
    %153 = arith.divf %151, %152 : vector<8x128xf32>
    %154 = vector.extract_strided_slice %147 {offsets = [0, 128], sizes = [8, 128], strides = [1, 1]} : vector<8x512xf32> to vector<8x128xf32>
    %155 = arith.negf %154 : vector<8x128xf32>
    %156 = math.exp %155 : vector<8x128xf32>
    %cst_42 = arith.constant 1.000000e+00 : f32
    %157 = vector.broadcast %cst_42 : f32 to vector<8x128xf32>
    %158 = arith.addf %157, %156 : vector<8x128xf32>
    %159 = arith.divf %157, %158 : vector<8x128xf32>
    %160 = vector.extract_strided_slice %147 {offsets = [0, 256], sizes = [8, 128], strides = [1, 1]} : vector<8x512xf32> to vector<8x128xf32>
    %161 = math.tanh %160 : vector<8x128xf32>
    %162 = vector.extract_strided_slice %147 {offsets = [0, 384], sizes = [8, 128], strides = [1, 1]} : vector<8x512xf32> to vector<8x128xf32>
    %163 = arith.negf %162 : vector<8x128xf32>
    %164 = math.exp %163 : vector<8x128xf32>
    %cst_43 = arith.constant 1.000000e+00 : f32
    %165 = vector.broadcast %cst_43 : f32 to vector<8x128xf32>
    %166 = arith.addf %165, %164 : vector<8x128xf32>
    %167 = arith.divf %165, %166 : vector<8x128xf32>
    %168 = arith.mulf %159, %137 : vector<8x128xf32>
    %169 = arith.mulf %153, %161 : vector<8x128xf32>
    %170 = arith.addf %168, %169 : vector<8x128xf32>
    %171 = math.tanh %170 : vector<8x128xf32>
    %172 = arith.mulf %167, %171 : vector<8x128xf32>
    %173 = arith.index_cast %143 : i32 to index
    %c0_44 = arith.constant 0 : index
    %174 = vector.load %arg11[%173, %c0_44] : memref<64x128xf32, #tpu.memory_space<vmem>>, vector<8x128xf32>
    tpu.vector_store %arg11[%173, %c0_44], %172 {strides = array<i32>} : memref<64x128xf32, #tpu.memory_space<vmem>>, vector<8x128xf32>,
    %c5_i32 = arith.constant 5 : i32
    %c8_i32_45 = arith.constant 8 : i32
    %175 = arith.muli %c5_i32, %c8_i32_45 : i32
    %176 = tpu.assume_multiple %175, 8 : i32
    %177 = arith.index_cast %176 : i32 to index
    %c0_46 = arith.constant 0 : index
    %178 = vector.load %arg10[%177, %c0_46] : memref<64x512xf32, #tpu.memory_space<vmem>>, vector<8x512xf32>
    %cst_47 = arith.constant dense<0.000000e+00> : vector<8x512xf32>
    %179 = tpu.matmul %172, %7, %cst_47 {dimension_numbers = #tpu.dot_dimension_numbers<[1], [0], [0], [1], [0, 0, 1, 1], [], []>} : vector<8x128xf32>, vector<128x512xf32>, vector<8x512xf32> -> vector<8x512xf32>
    %180 = arith.addf %178, %179 : vector<8x512xf32>
    %181 = vector.extract_strided_slice %180 {offsets = [0, 0], sizes = [8, 128], strides = [1, 1]} : vector<8x512xf32> to vector<8x128xf32>
    %182 = arith.negf %181 : vector<8x128xf32>
    %183 = math.exp %182 : vector<8x128xf32>
    %cst_48 = arith.constant 1.000000e+00 : f32
    %184 = vector.broadcast %cst_48 : f32 to vector<8x128xf32>
    %185 = arith.addf %184, %183 : vector<8x128xf32>
    %186 = arith.divf %184, %185 : vector<8x128xf32>
    %187 = vector.extract_strided_slice %180 {offsets = [0, 128], sizes = [8, 128], strides = [1, 1]} : vector<8x512xf32> to vector<8x128xf32>
    %188 = arith.negf %187 : vector<8x128xf32>
    %189 = math.exp %188 : vector<8x128xf32>
    %cst_49 = arith.constant 1.000000e+00 : f32
    %190 = vector.broadcast %cst_49 : f32 to vector<8x128xf32>
    %191 = arith.addf %190, %189 : vector<8x128xf32>
    %192 = arith.divf %190, %191 : vector<8x128xf32>
    %193 = vector.extract_strided_slice %180 {offsets = [0, 256], sizes = [8, 128], strides = [1, 1]} : vector<8x512xf32> to vector<8x128xf32>
    %194 = math.tanh %193 : vector<8x128xf32>
    %195 = vector.extract_strided_slice %180 {offsets = [0, 384], sizes = [8, 128], strides = [1, 1]} : vector<8x512xf32> to vector<8x128xf32>
    %196 = arith.negf %195 : vector<8x128xf32>
    %197 = math.exp %196 : vector<8x128xf32>
    %cst_50 = arith.constant 1.000000e+00 : f32
    %198 = vector.broadcast %cst_50 : f32 to vector<8x128xf32>
    %199 = arith.addf %198, %197 : vector<8x128xf32>
    %200 = arith.divf %198, %199 : vector<8x128xf32>
    %201 = arith.mulf %192, %170 : vector<8x128xf32>
    %202 = arith.mulf %186, %194 : vector<8x128xf32>
    %203 = arith.addf %201, %202 : vector<8x128xf32>
    %204 = math.tanh %203 : vector<8x128xf32>
    %205 = arith.mulf %200, %204 : vector<8x128xf32>
    %206 = arith.index_cast %176 : i32 to index
    %c0_51 = arith.constant 0 : index
    %207 = vector.load %arg11[%206, %c0_51] : memref<64x128xf32, #tpu.memory_space<vmem>>, vector<8x128xf32>
    tpu.vector_store %arg11[%206, %c0_51], %205 {strides = array<i32>} : memref<64x128xf32, #tpu.memory_space<vmem>>, vector<8x128xf32>,
    %c6_i32 = arith.constant 6 : i32
    %c8_i32_52 = arith.constant 8 : i32
    %208 = arith.muli %c6_i32, %c8_i32_52 : i32
    %209 = tpu.assume_multiple %208, 8 : i32
    %210 = arith.index_cast %209 : i32 to index
    %c0_53 = arith.constant 0 : index
    %211 = vector.load %arg10[%210, %c0_53] : memref<64x512xf32, #tpu.memory_space<vmem>>, vector<8x512xf32>
    %cst_54 = arith.constant dense<0.000000e+00> : vector<8x512xf32>
    %212 = tpu.matmul %205, %7, %cst_54 {dimension_numbers = #tpu.dot_dimension_numbers<[1], [0], [0], [1], [0, 0, 1, 1], [], []>} : vector<8x128xf32>, vector<128x512xf32>, vector<8x512xf32> -> vector<8x512xf32>
    %213 = arith.addf %211, %212 : vector<8x512xf32>
    %214 = vector.extract_strided_slice %213 {offsets = [0, 0], sizes = [8, 128], strides = [1, 1]} : vector<8x512xf32> to vector<8x128xf32>
    %215 = arith.negf %214 : vector<8x128xf32>
    %216 = math.exp %215 : vector<8x128xf32>
    %cst_55 = arith.constant 1.000000e+00 : f32
    %217 = vector.broadcast %cst_55 : f32 to vector<8x128xf32>
    %218 = arith.addf %217, %216 : vector<8x128xf32>
    %219 = arith.divf %217, %218 : vector<8x128xf32>
    %220 = vector.extract_strided_slice %213 {offsets = [0, 128], sizes = [8, 128], strides = [1, 1]} : vector<8x512xf32> to vector<8x128xf32>
    %221 = arith.negf %220 : vector<8x128xf32>
    %222 = math.exp %221 : vector<8x128xf32>
    %cst_56 = arith.constant 1.000000e+00 : f32
    %223 = vector.broadcast %cst_56 : f32 to vector<8x128xf32>
    %224 = arith.addf %223, %222 : vector<8x128xf32>
    %225 = arith.divf %223, %224 : vector<8x128xf32>
    %226 = vector.extract_strided_slice %213 {offsets = [0, 256], sizes = [8, 128], strides = [1, 1]} : vector<8x512xf32> to vector<8x128xf32>
    %227 = math.tanh %226 : vector<8x128xf32>
    %228 = vector.extract_strided_slice %213 {offsets = [0, 384], sizes = [8, 128], strides = [1, 1]} : vector<8x512xf32> to vector<8x128xf32>
    %229 = arith.negf %228 : vector<8x128xf32>
    %230 = math.exp %229 : vector<8x128xf32>
    %cst_57 = arith.constant 1.000000e+00 : f32
    %231 = vector.broadcast %cst_57 : f32 to vector<8x128xf32>
    %232 = arith.addf %231, %230 : vector<8x128xf32>
    %233 = arith.divf %231, %232 : vector<8x128xf32>
    %234 = arith.mulf %225, %203 : vector<8x128xf32>
    %235 = arith.mulf %219, %227 : vector<8x128xf32>
    %236 = arith.addf %234, %235 : vector<8x128xf32>
    %237 = math.tanh %236 : vector<8x128xf32>
    %238 = arith.mulf %233, %237 : vector<8x128xf32>
    %239 = arith.index_cast %209 : i32 to index
    %c0_58 = arith.constant 0 : index
    %240 = vector.load %arg11[%239, %c0_58] : memref<64x128xf32, #tpu.memory_space<vmem>>, vector<8x128xf32>
    tpu.vector_store %arg11[%239, %c0_58], %238 {strides = array<i32>} : memref<64x128xf32, #tpu.memory_space<vmem>>, vector<8x128xf32>,
    %c7_i32 = arith.constant 7 : i32
    %c8_i32_59 = arith.constant 8 : i32
    %241 = arith.muli %c7_i32, %c8_i32_59 : i32
    %242 = tpu.assume_multiple %241, 8 : i32
    %243 = arith.index_cast %242 : i32 to index
    %c0_60 = arith.constant 0 : index
    %244 = vector.load %arg10[%243, %c0_60] : memref<64x512xf32, #tpu.memory_space<vmem>>, vector<8x512xf32>
    %cst_61 = arith.constant dense<0.000000e+00> : vector<8x512xf32>
    %245 = tpu.matmul %238, %7, %cst_61 {dimension_numbers = #tpu.dot_dimension_numbers<[1], [0], [0], [1], [0, 0, 1, 1], [], []>} : vector<8x128xf32>, vector<128x512xf32>, vector<8x512xf32> -> vector<8x512xf32>
    %246 = arith.addf %244, %245 : vector<8x512xf32>
    %247 = vector.extract_strided_slice %246 {offsets = [0, 0], sizes = [8, 128], strides = [1, 1]} : vector<8x512xf32> to vector<8x128xf32>
    %248 = arith.negf %247 : vector<8x128xf32>
    %249 = math.exp %248 : vector<8x128xf32>
    %cst_62 = arith.constant 1.000000e+00 : f32
    %250 = vector.broadcast %cst_62 : f32 to vector<8x128xf32>
    %251 = arith.addf %250, %249 : vector<8x128xf32>
    %252 = arith.divf %250, %251 : vector<8x128xf32>
    %253 = vector.extract_strided_slice %246 {offsets = [0, 128], sizes = [8, 128], strides = [1, 1]} : vector<8x512xf32> to vector<8x128xf32>
    %254 = arith.negf %253 : vector<8x128xf32>
    %255 = math.exp %254 : vector<8x128xf32>
    %cst_63 = arith.constant 1.000000e+00 : f32
    %256 = vector.broadcast %cst_63 : f32 to vector<8x128xf32>
    %257 = arith.addf %256, %255 : vector<8x128xf32>
    %258 = arith.divf %256, %257 : vector<8x128xf32>
    %259 = vector.extract_strided_slice %246 {offsets = [0, 256], sizes = [8, 128], strides = [1, 1]} : vector<8x512xf32> to vector<8x128xf32>
    %260 = math.tanh %259 : vector<8x128xf32>
    %261 = vector.extract_strided_slice %246 {offsets = [0, 384], sizes = [8, 128], strides = [1, 1]} : vector<8x512xf32> to vector<8x128xf32>
    %262 = arith.negf %261 : vector<8x128xf32>
    %263 = math.exp %262 : vector<8x128xf32>
    %cst_64 = arith.constant 1.000000e+00 : f32
    %264 = vector.broadcast %cst_64 : f32 to vector<8x128xf32>
    %265 = arith.addf %264, %263 : vector<8x128xf32>
    %266 = arith.divf %264, %265 : vector<8x128xf32>
    %267 = arith.mulf %258, %236 : vector<8x128xf32>
    %268 = arith.mulf %252, %260 : vector<8x128xf32>
    %269 = arith.addf %267, %268 : vector<8x128xf32>
    %270 = math.tanh %269 : vector<8x128xf32>
    %271 = arith.mulf %266, %270 : vector<8x128xf32>
    %272 = arith.index_cast %242 : i32 to index
    %c0_65 = arith.constant 0 : index
    %273 = vector.load %arg11[%272, %c0_65] : memref<64x128xf32, #tpu.memory_space<vmem>>, vector<8x128xf32>
    tpu.vector_store %arg11[%272, %c0_65], %271 {strides = array<i32>} : memref<64x128xf32, #tpu.memory_space<vmem>>, vector<8x128xf32>,
    %c8_i32_66 = arith.constant 8 : i32
    %c0_67 = arith.constant 0 : index
    %c0_68 = arith.constant 0 : index
    %274 = vector.load %arg11[%c0_67, %c0_68] : memref<64x128xf32, #tpu.memory_space<vmem>>, vector<64x128xf32>
    %c0_69 = arith.constant 0 : index
    %c0_70 = arith.constant 0 : index
    %275 = vector.load %arg5[%c0_69, %c0_70] : memref<128x256xf32, #tpu.memory_space<vmem>>, vector<128x256xf32>
    %cst_71 = arith.constant dense<0.000000e+00> : vector<64x256xf32>
    %276 = tpu.matmul %274, %275, %cst_71 {dimension_numbers = #tpu.dot_dimension_numbers<[1], [0], [0], [1], [0, 0, 1, 1], [], []>} : vector<64x128xf32>, vector<128x256xf32>, vector<64x256xf32> -> vector<64x256xf32>
    %c0_72 = arith.constant 0 : index
    %c0_73 = arith.constant 0 : index
    %277 = vector.load %arg6[%c0_72, %c0_73] : memref<1x256xf32, #tpu.memory_space<vmem>>, vector<1x256xf32>
    %278 = vector.broadcast %277 : vector<1x256xf32> to vector<64x256xf32>
    %279 = arith.addf %276, %278 : vector<64x256xf32>
    %cst_74 = arith.constant 0.000000e+00 : f32
    %280 = vector.broadcast %cst_74 : f32 to vector<64x256xf32>
    %281 = arith.maximumf %279, %280 : vector<64x256xf32>
    %c0_75 = arith.constant 0 : index
    %c0_76 = arith.constant 0 : index
    %282 = vector.load %arg7[%c0_75, %c0_76] : memref<256x128xf32, #tpu.memory_space<vmem>>, vector<256x128xf32>
    %cst_77 = arith.constant dense<0.000000e+00> : vector<64x128xf32>
    %283 = tpu.matmul %281, %282, %cst_77 {dimension_numbers = #tpu.dot_dimension_numbers<[1], [0], [0], [1], [0, 0, 1, 1], [], []>} : vector<64x256xf32>, vector<256x128xf32>, vector<64x128xf32> -> vector<64x128xf32>
    %c0_78 = arith.constant 0 : index
    %c0_79 = arith.constant 0 : index
    %284 = vector.load %arg8[%c0_78, %c0_79] : memref<1x128xf32, #tpu.memory_space<vmem>>, vector<1x128xf32>
    %285 = vector.broadcast %284 : vector<1x128xf32> to vector<64x128xf32>
    %286 = arith.addf %283, %285 : vector<64x128xf32>
    %c0_80 = arith.constant 0 : index
    %c0_81 = arith.constant 0 : index
    %287 = vector.load %arg9[%c0_80, %c0_81] : memref<64x128xf32, #tpu.memory_space<vmem>>, vector<64x128xf32>
    tpu.vector_store %arg9[%c0_80, %c0_81], %286 {strides = array<i32>} : memref<64x128xf32, #tpu.memory_space<vmem>>, vector<64x128xf32>,
    return
  }
  func.func @transform_0(%arg0: i32) -> (i32, i32) {
    %c0_i32 = arith.constant 0 : i32
    %c0_i32_0 = arith.constant 0 : i32
    %c0_i32_1 = arith.constant 0 : i32
    return %c0_i32, %c0_i32_0 : i32, i32
  }
  func.func @transform_1(%arg0: i32) -> (i32, i32) {
    %c0_i32 = arith.constant 0 : i32
    %c0_i32_0 = arith.constant 0 : i32
    %c0_i32_1 = arith.constant 0 : i32
    return %c0_i32, %c0_i32_0 : i32, i32
  }
  func.func @transform_2(%arg0: i32) -> (i32, i32) {
    %c0_i32 = arith.constant 0 : i32
    %c0_i32_0 = arith.constant 0 : i32
    %c0_i32_1 = arith.constant 0 : i32
    return %c0_i32, %c0_i32_0 : i32, i32
  }
  func.func @transform_3(%arg0: i32) -> (i32, i32) {
    %c0_i32 = arith.constant 0 : i32
    %c0_i32_0 = arith.constant 0 : i32
    %c0_i32_1 = arith.constant 0 : i32
    return %c0_i32, %c0_i32_0 : i32, i32
  }
  func.func @transform_4(%arg0: i32) -> (i32, i32) {
    %c0_i32 = arith.constant 0 : i32
    %c0_i32_0 = arith.constant 0 : i32
    %c0_i32_1 = arith.constant 0 : i32
    return %c0_i32, %c0_i32_0 : i32, i32
  }
  func.func @transform_5(%arg0: i32) -> (i32, i32) {
    %c0_i32 = arith.constant 0 : i32
    %c0_i32_0 = arith.constant 0 : i32
    %c0_i32_1 = arith.constant 0 : i32
    return %c0_i32, %c0_i32_0 : i32, i32
  }
  func.func @transform_6(%arg0: i32) -> (i32, i32) {
    %c0_i32 = arith.constant 0 : i32
    %c0_i32_0 = arith.constant 0 : i32
    %c0_i32_1 = arith.constant 0 : i32
    return %c0_i32, %c0_i32_0 : i32, i32
  }
  func.func @transform_7(%arg0: i32) -> (i32, i32) {
    %c0_i32 = arith.constant 0 : i32
    %c0_i32_0 = arith.constant 0 : i32
    %c0_i32_1 = arith.constant 0 : i32
    return %c0_i32, %c0_i32_0 : i32, i32
  }
  func.func @transform_8(%arg0: i32) -> (i32, i32) {
    %c0_i32 = arith.constant 0 : i32
    %c0_i32_0 = arith.constant 0 : i32
    %c0_i32_1 = arith.constant 0 : i32
    return %c0_i32, %c0_i32_0 : i32, i32
  }
}

</mosaic_0001>

<bundles_post_ra>
// kernel: lstm_predictor_forward.1
= control target key start
LH: loop header
LB: loop body
LE: loop exit
PB: predicated region body
PF: predicated region fallthrough
CT: control target
= control target key end

     0   :  { %v3063_v3 = vmov 0.0   ;;  %vm67_vm0 = vcmask 130048   ;;  %s4089_s1 = inlined_call_operand.vmem [shape: f32[16,512], index: 1, kind: input, shape index: {}]   ;;  %s4090_s0 = inlined_call_operand.vmem [shape: f32[64,16], index: 0, kind: input, shape index: {}]   ;;  %s4091_s2 = inlined_call_operand.vmem [shape: f32[128,512], index: 2, kind: input, shape index: {}]   ;;  %s4092_s3 = inlined_call_operand.vmem [shape: f32[1,512], index: 3, kind: input, shape index: {}]   ;;  %s4093_s4 = inlined_call_operand.vmem [shape: f32[128,256], index: 4, kind: input, shape index: {}]   ;;  %s4094_s6 = inlined_call_operand.vmem [shape: f32[256,128], index: 6, kind: input, shape index: {}]   ;;  %s4095_s5 = inlined_call_operand.vmem [shape: f32[1,256], index: 5, kind: input, shape index: {}]   ;;  %s4096_s7 = inlined_call_operand.vmem [shape: f32[1,128], index: 7, kind: input, shape index: {}]   ;;  %s4097_s8 = inlined_call_operand.vmem [shape: f32[64,128], index: 8, kind: output, shape index: {}]  }
   0x1   :  { %v38_v0 = vld [vmem:[%s4089_s1 + $0x8] sm:$0xff]  ;;  %v40_v2 = vld [vmem:[%s4089_s1 + $0x18] sm:$0xff]  ;;  %156 = vmatprep.mubr.f32.mxu0 %v3063_v3  ;;  %269 = vmatprep.mubr.f32.mxu1 %v3063_v3  ;;  %v37_v6 = vld [vmem:[%s4089_s1] sm:$0xff] }
   0x2   :  { %v42_v1 = vld [vmem:[%s4089_s1 + $0x28] sm:$0xff]  ;;  %v44_v5 = vld [vmem:[%s4089_s1 + $0x38] sm:$0xff]  ;;  %v41_v7 = vld [vmem:[%s4089_s1 + $0x20] sm:$0xff] }
   0x3   :  { %v2286_v4 = vpack.c.bf16 %v42_v1, %v38_v0  ;;  %v2290_v8 = vpack.c.bf16 %v44_v5, %v40_v2  ;;  %v2288_v9 = vpack.c.bf16 %v41_v7, %v37_v6  ;;  %v39_v10 = vld [vmem:[%s4089_s1 + $0x10] sm:$0xff]  ;;  %v29_v12 = vld [vmem:[%s4090_s0] sm:$0xff]  ;;  %v351_v14 = vld [vmem:[%s4091_s2 + $0x8] sm:$0xff] }
   0x4   :  { %v43_v11 = vld [vmem:[%s4089_s1 + $0x30] sm:$0xff]  ;;  %v355_v15 = vld [vmem:[%s4091_s2 + $0x28] sm:$0xff]  ;;  %v353_v16 = vld [vmem:[%s4091_s2 + $0x18] sm:$0xff] }
   0x5   :  { %2287 = vmatprep.subr.bf16.mxu0 %v2286_v4  ;;  %v2292_v13 = vpack.c.bf16 %v43_v11, %v39_v10  ;;  %2291 = vmatprep.subr.bf16.mxu1 %v2290_v8  ;;  %v3147_v17 = vpack.c.bf16 %v355_v15, %v351_v14  ;;  %v357_v18 = vld [vmem:[%s4091_s2 + $0x38] sm:$0xff]  ;;  %v350_v19 = vld [vmem:[%s4091_s2] sm:$0xff]  ;;  %v352_v23 = vld [vmem:[%s4091_s2 + $0x10] sm:$0xff] }
   0x6   :  { %2289 = vmatpush1.bf16.msra.mxu0 %v2288_v9  ;;  %v354_v20 = vld [vmem:[%s4091_s2 + $0x20] sm:$0xff]  ;;  %v3158_v21 = vpack.c.bf16 %v357_v18, %v353_v16  ;;  %v356_v24 = vld [vmem:[%s4091_s2 + $0x30] sm:$0xff]  ;;  %v359_v26 = vld [vmem:[%s4091_s2 + $0x48] sm:$0xff] }
   0x7   :  { %2293 = vmatpush1.bf16.msra.mxu1 %v2292_v13  ;;  %v3160_v22 = vpack.c.bf16 %v354_v20, %v350_v19  ;;  %2295 = vmatprep.subr.bf16.mxu0 %v3147_v17  ;;  %v3169_v25 = vpack.c.bf16 %v356_v24, %v352_v23  ;;  %v363_v27 = vld [vmem:[%s4091_s2 + $0x68] sm:$0xff]  ;;  %v361_v28 = vld [vmem:[%s4091_s2 + $0x58] sm:$0xff]  ;;  %v358_v31 = vld [vmem:[%s4091_s2 + $0x40] sm:$0xff] }
   0x8   :  { %2327 = vmatprep.subr.bf16.mxu1 %v3158_v21  ;;  %v3182_v29 = vpack.c.bf16 %v363_v27, %v359_v26  ;;  %v365_v30 = vld [vmem:[%s4091_s2 + $0x78] sm:$0xff]  ;;  %v362_v32 = vld [vmem:[%s4091_s2 + $0x60] sm:$0xff]  ;;  %v30_v33 = vld [vmem:[%s4090_s0 + $0x8] sm:$0xff] }
   0x9   :  { %2189 = vmatmul.mubr.msk.f32.vlgmr.msra.gmra.mrb[0].mxu0 %vm67_vm0, %v29_v12  ;;  %v3198_v34 = vpack.c.bf16 %v365_v30, %v361_v28  ;;  %v3200_v35 = vpack.c.bf16 %v362_v32, %v358_v31  ;;  %v360_v36 = vld [vmem:[%s4091_s2 + $0x50] sm:$0xff]  ;;  %v367_v39 = vld [vmem:[%s4091_s2 + $0x88] sm:$0xff]  ;;  %v369_v41 = vld [vmem:[%s4091_s2 + $0x98] sm:$0xff] }
   0xa   :  { %2197 = vmatmul.mubr.msk.f32.vlgmr.msra.gmra.mrb[0].mxu1 %vm67_vm0, %v29_v12  ;;  %2297 = vmatpush1.bf16.msra.mxu0 %v3160_v22  ;;  %v364_v37 = vld [vmem:[%s4091_s2 + $0x70] sm:$0xff]  ;;  %v371_v40 = vld [vmem:[%s4091_s2 + $0xa8] sm:$0xff]  ;;  %v373_v43 = vld [vmem:[%s4091_s2 + $0xb8] sm:$0xff] }
   0xb   :  { %2329 = vmatpush1.bf16.msra.mxu1 %v3169_v25  ;;  %162 = vmatprep.mubr.f32.mxu0 %v3063_v3  ;;  %v3210_v38 = vpack.c.bf16 %v364_v37, %v360_v36  ;;  %v3223_v42 = vpack.c.bf16 %v371_v40, %v367_v39  ;;  %v366_v44 = vld [vmem:[%s4091_s2 + $0x80] sm:$0xff]  ;;  %v31_v46 = vld [vmem:[%s4090_s0 + $0x10] sm:$0xff]  ;;  %v3239_v47 = vpack.c.bf16 %v373_v43, %v369_v41  ;;  %v375_v51 = vld [vmem:[%s4091_s2 + $0xc8] sm:$0xff] }
   0xc   :  { %275 = vmatprep.mubr.f32.mxu1 %v3063_v3  ;;  %2299 = vmatprep.subr.bf16.mxu0 %v3182_v29  ;;  %v370_v45 = vld [vmem:[%s4091_s2 + $0xa0] sm:$0xff]  ;;  %v368_v48 = vld [vmem:[%s4091_s2 + $0x90] sm:$0xff]  ;;  %v379_v52 = vld [vmem:[%s4091_s2 + $0xe8] sm:$0xff] }
   0xd   :  { %2190 = vmatmul.mubr.msk.f32.gmra.mrb[2].mxu0 %vm67_vm0, %v30_v33  ;;  %2331 = vmatprep.subr.bf16.mxu1 %v3198_v34  ;;  %v372_v49 = vld [vmem:[%s4091_s2 + $0xb0] sm:$0xff]  ;;  %v3249_v50 = vpack.c.bf16 %v370_v45, %v366_v44  ;;  %v377_v53 = vld [vmem:[%s4091_s2 + $0xd8] sm:$0xff]  ;;  %v374_v56 = vld [vmem:[%s4091_s2 + $0xc0] sm:$0xff]  ;;  %v3275_v58 = vpack.c.bf16 %v379_v52, %v375_v51 }
   0xe   :  { %2198 = vmatmul.mubr.msk.f32.gmra.mrb[2].mxu1 %vm67_vm0, %v30_v33  ;;  %2301 = vmatpush1.bf16.msra.mxu0 %v3200_v35  ;;  %v3262_v54 = vpack.c.bf16 %v372_v49, %v368_v48  ;;  %v381_v55 = vld [vmem:[%s4091_s2 + $0xf8] sm:$0xff]  ;;  %v378_v57 = vld [vmem:[%s4091_s2 + $0xe0] sm:$0xff]  ;;  %v376_v59 = vld [vmem:[%s4091_s2 + $0xd0] sm:$0xff] }
   0xf   :  { %2333 = vmatpush1.bf16.msra.mxu1 %v3210_v38  ;;  %168 = vmatprep.mubr.f32.mxu0 %v3063_v3  ;;  %v380_v60 = vld [vmem:[%s4091_s2 + $0xf0] sm:$0xff]  ;;  %v3285_v61 = vpack.c.bf16 %v381_v55, %v377_v53  ;;  %v383_v62 = vld [vmem:[%s4091_s2 + $0x108] sm:$0xff]  ;;  %v32_v0 = vld [vmem:[%s4090_s0 + $0x18] sm:$0xff]  ;;  %v3298_v1 = vpack.c.bf16 %v378_v57, %v374_v56 }
  0x10   :  { %281 = vmatprep.mubr.f32.mxu1 %v3063_v3  ;;  %2303 = vmatprep.subr.bf16.mxu0 %v3223_v42  ;;  %v387_v63 = vld [vmem:[%s4091_s2 + $0x128] sm:$0xff]  ;;  %v385_v2 = vld [vmem:[%s4091_s2 + $0x118] sm:$0xff]  ;;  %v3308_v5 = vpack.c.bf16 %v380_v60, %v376_v59  ;;  %v382_v6 = vld [vmem:[%s4091_s2 + $0x100] sm:$0xff] }
  0x11   :  { %2191 = vmatmul.mubr.msk.f32.gmra.mrb[4].mxu0 %vm67_vm0, %v31_v46  ;;  %2335 = vmatprep.subr.bf16.mxu1 %v3239_v47  ;;  %v389_v4 = vld [vmem:[%s4091_s2 + $0x138] sm:$0xff]  ;;  %v386_v7 = vld [vmem:[%s4091_s2 + $0x120] sm:$0xff]  ;;  %v3318_v8 = vpack.c.bf16 %v387_v63, %v383_v62  ;;  %v384_v9 = vld [vmem:[%s4091_s2 + $0x110] sm:$0xff] }
  0x12   :  { %2199 = vmatmul.mubr.msk.f32.gmra.mrb[4].mxu1 %vm67_vm0, %v31_v46  ;;  %2305 = vmatpush1.bf16.msra.mxu0 %v3249_v50  ;;  %v388_v10 = vld [vmem:[%s4091_s2 + $0x130] sm:$0xff]  ;;  %v3328_v11 = vpack.c.bf16 %v389_v4, %v385_v2  ;;  %v391_v12 = vld [vmem:[%s4091_s2 + $0x148] sm:$0xff]  ;;  %v33_v14 = vld [vmem:[%s4090_s0 + $0x20] sm:$0xff]  ;;  %v3341_v15 = vpack.c.bf16 %v386_v7, %v382_v6  ;;  %v47_v7 = vlaneseq }
  0x13   :  { %2337 = vmatpush1.bf16.msra.mxu1 %v3262_v54  ;;  %174 = vmatprep.mubr.f32.mxu0 %v3063_v3  ;;  %v395_v13 = vld [vmem:[%s4091_s2 + $0x168] sm:$0xff]  ;;  %v393_v16 = vld [vmem:[%s4091_s2 + $0x158] sm:$0xff]  ;;  %v3351_v19 = vpack.c.bf16 %v388_v10, %v384_v9  ;;  %v390_v20 = vld [vmem:[%s4091_s2 + $0x140] sm:$0xff] }
  0x14   :  { %287 = vmatprep.mubr.f32.mxu1 %v3063_v3  ;;  %2307 = vmatprep.subr.bf16.mxu0 %v3275_v58  ;;  %v397_v18 = vld [vmem:[%s4091_s2 + $0x178] sm:$0xff]  ;;  %v394_v23 = vld [vmem:[%s4091_s2 + $0x160] sm:$0xff]  ;;  %v3361_v24 = vpack.c.bf16 %v395_v13, %v391_v12  ;;  %v392_v26 = vld [vmem:[%s4091_s2 + $0x150] sm:$0xff]  ;;  %v3517_v9 = vshrl.u32 %v47_v7, 7 }
  0x15   :  { %2192 = vmatmul.mubr.msk.f32.gmra.mrb[6].mxu0 %vm67_vm0, %v32_v0  ;;  %2339 = vmatprep.subr.bf16.mxu1 %v3285_v61  ;;  %v396_v27 = vld [vmem:[%s4091_s2 + $0x170] sm:$0xff]  ;;  %v3371_v28 = vpack.c.bf16 %v397_v18, %v393_v16  ;;  %v399_v30 = vld [vmem:[%s4091_s2 + $0x188] sm:$0xff]  ;;  %v3384_v33 = vpack.c.bf16 %v394_v23, %v390_v20  ;;  %v401_v36 = vld [vmem:[%s4091_s2 + $0x198] sm:$0xff] }
  0x16   :  { %2200 = vmatmul.mubr.msk.f32.gmra.mrb[6].mxu1 %vm67_vm0, %v32_v0  ;;  %2309 = vmatpush1.bf16.msra.mxu0 %v3298_v1  ;;  %v403_v31 = vld [vmem:[%s4091_s2 + $0x1a8] sm:$0xff]  ;;  %v405_v37 = vld [vmem:[%s4091_s2 + $0x1b8] sm:$0xff]  ;;  %v3394_v39 = vpack.c.bf16 %v396_v27, %v392_v26  ;;  %v398_v40 = vld [vmem:[%s4091_s2 + $0x180] sm:$0xff]  ;;  %v49_v10 = vsub.s32 0, %v3517_v9  ;;  %v53_v13 = vsub.s32 1, %v3517_v9  ;;  %v61_v20 = vsub.s32 3, %v3517_v9 }
  0x17   :  { %2341 = vmatpush1.bf16.msra.mxu1 %v3308_v5  ;;  %180 = vmatprep.mubr.f32.mxu0 %v3063_v3  ;;  %v34_v32 = vld [vmem:[%s4090_s0 + $0x28] sm:$0xff]  ;;  %v402_v41 = vld [vmem:[%s4091_s2 + $0x1a0] sm:$0xff]  ;;  %v3404_v43 = vpack.c.bf16 %v403_v31, %v399_v30  ;;  %v400_v44 = vld [vmem:[%s4091_s2 + $0x190] sm:$0xff]  ;;  %v3414_v46 = vpack.c.bf16 %v405_v37, %v401_v36 }
  0x18   :  { %293 = vmatprep.mubr.f32.mxu1 %v3063_v3  ;;  %2311 = vmatprep.subr.bf16.mxu0 %v3318_v8  ;;  %v404_v45 = vld [vmem:[%s4091_s2 + $0x1b0] sm:$0xff]  ;;  %v407_v48 = vld [vmem:[%s4091_s2 + $0x1c8] sm:$0xff]  ;;  %v3427_v52 = vpack.c.bf16 %v402_v41, %v398_v40  ;;  %v409_v53 = vld [vmem:[%s4091_s2 + $0x1d8] sm:$0xff]  ;;  %v57_v40 = vsub.s32 2, %v3517_v9 }
  0x19   :  { %2193 = vmatmul.mubr.msk.f32.gmra.mrb[8].mxu0 %vm67_vm0, %v33_v14  ;;  %2343 = vmatprep.subr.bf16.mxu1 %v3328_v11  ;;  %v411_v49 = vld [vmem:[%s4091_s2 + $0x1e8] sm:$0xff]  ;;  %v35_v51 = vld [vmem:[%s4090_s0 + $0x30] sm:$0xff]  ;;  %v413_v55 = vld [vmem:[%s4091_s2 + $0x1f8] sm:$0xff]  ;;  %v3437_v56 = vpack.c.bf16 %v404_v45, %v400_v44 }
  0x1a   :  { %2201 = vmatmul.mubr.msk.f32.gmra.mrb[8].mxu1 %vm67_vm0, %v33_v14  ;;  %2313 = vmatpush1.bf16.msra.mxu0 %v3341_v15  ;;  %v406_v57 = vld [vmem:[%s4091_s2 + $0x1c0] sm:$0xff]  ;;  %v3447_v60 = vpack.c.bf16 %v411_v49, %v407_v48  ;;  %v408_v62 = vld [vmem:[%s4091_s2 + $0x1d0] sm:$0xff]  ;;  %v3457_v0 = vpack.c.bf16 %v413_v55, %v409_v53  ;;  %v36_v2 = vld [vmem:[%s4090_s0 + $0x38] sm:$0xff] }
  0x1b   :  { %2345 = vmatpush1.bf16.msra.mxu1 %v3351_v19  ;;  %186 = vmatprep.mubr.f32.mxu0 %v3063_v3  ;;  %v410_v59 = vld [vmem:[%s4091_s2 + $0x1e0] sm:$0xff]  ;;  %v412_v63 = vld [vmem:[%s4091_s2 + $0x1f0] sm:$0xff] }
  0x1c   :  { %299 = vmatprep.mubr.f32.mxu1 %v3063_v3  ;;  %2315 = vmatprep.subr.bf16.mxu0 %v3361_v24  ;;  %v3464_v4 = vpack.c.bf16 %v410_v59, %v406_v57  ;;  %v3468_v6 = vpack.c.bf16 %v412_v63, %v408_v62  ;;  %v45_v12 = vld [vmem:[%s4092_s3] sm:$0xf] }
  0x1d   :  { %2194 = vmatmul.mubr.msk.f32.gmra.mrb[10].mxu0 %vm67_vm0, %v34_v32  ;;  %2347 = vmatprep.subr.bf16.mxu1 %v3371_v28  ;;  %v3526_v14 = vrot.slane %v45_v12, %v49_v10  ;;  %v3530_v16 = vrot.slane %v45_v12, %v53_v13  ;;  %v3535_v37 = vrot.slane %v45_v12, %v61_v20 }
  0x1e   :  { %2202 = vmatmul.mubr.msk.f32.gmra.mrb[10].mxu1 %vm67_vm0, %v34_v32  ;;  %2317 = vmatpush1.bf16.msra.mxu0 %v3384_v33  ;;  %v3539_v44 = vrot.slane %v45_v12, %v57_v40 }
  0x1f   :  { %2349 = vmatpush1.bf16.msra.mxu1 %v3394_v39  ;;  %192 = vmatprep.mubr.f32.mxu0 %v3063_v3 }
  0x20   :  { %305 = vmatprep.mubr.f32.mxu1 %v3063_v3  ;;  %2319 = vmatprep.subr.bf16.mxu0 %v3404_v43 }
  0x21   :  { %2195 = vmatmul.mubr.msk.f32.gmra.mrb[12].mxu0 %vm67_vm0, %v35_v51  ;;  %2351 = vmatprep.subr.bf16.mxu1 %v3414_v46 }
  0x22   :  { %2203 = vmatmul.mubr.msk.f32.gmra.mrb[12].mxu1 %vm67_vm0, %v35_v51  ;;  %2321 = vmatpush1.bf16.msra.mxu0 %v3427_v52 }
  0x23   :  { %2353 = vmatpush1.bf16.msra.mxu1 %v3437_v56  ;;  %198 = vmatprep.mubr.f32.mxu0 %v3063_v3 }
  0x24   :  { %311 = vmatprep.mubr.f32.mxu1 %v3063_v3  ;;  %2323 = vmatprep.subr.bf16.mxu0 %v3447_v60 }
  0x25   :  { %2196 = vmatmul.mubr.msk.f32.gmra.mrb[14].mxu0 %vm67_vm0, %v36_v2  ;;  %2355 = vmatprep.subr.bf16.mxu1 %v3457_v0 }
  0x26   :  { %2204 = vmatmul.mubr.msk.f32.gmra.mrb[14].mxu1 %vm67_vm0, %v36_v2  ;;  %2325 = vmatpush1.bf16.msra.mxu0 %v3464_v4 }
  0x27   :  { %2357 = vmatpush1.bf16.msra.mxu1 %v3468_v6  ;;  %485 = vmatprep.mubr.f32.mxu0 %v3063_v3 }
  0x28   :  { %556 = vmatprep.mubr.f32.mxu1 %v3063_v3  ;;  %2359 = vmatprep.subr.bf16.mxu0 %v3147_v17 }
  0x29   :  { %486 = vmatmul.mubr.f32.vlgmr.msra.gmra.mrb[0].mxu0 %v3063_v3  ;;  %2391 = vmatprep.subr.bf16.mxu1 %v3158_v21 }
  0x2a   :  { %557 = vmatmul.mubr.f32.vlgmr.msra.gmra.mrb[0].mxu1 %v3063_v3  ;;  %2361 = vmatpush1.bf16.msra.mxu0 %v3160_v22 }
  0x2b   :  { %2393 = vmatpush1.bf16.msra.mxu1 %v3169_v25  ;;  %2363 = vmatprep.subr.bf16.mxu0 %v3182_v29 }
  0x2c   :  { %2395 = vmatprep.subr.bf16.mxu1 %v3198_v34  ;;  %663 = vmatprep.mubr.f32.mxu0 %v3063_v3 }
  0x2d   :  { %734 = vmatprep.mubr.f32.mxu1 %v3063_v3 }
  0x2e   :  { %2365 = vmatpush1.bf16.msra.mxu0 %v3200_v35 }
  0x2f   :  { %2397 = vmatpush1.bf16.msra.mxu1 %v3210_v38  ;;  %2367 = vmatprep.subr.bf16.mxu0 %v3223_v42 }
  0x30   :  { %2399 = vmatprep.subr.bf16.mxu1 %v3239_v47 }
  0x32   :  { %2369 = vmatpush1.bf16.msra.mxu0 %v3249_v50 }
  0x33   :  { %2401 = vmatpush1.bf16.msra.mxu1 %v3262_v54  ;;  %2371 = vmatprep.subr.bf16.mxu0 %v3275_v58 }
  0x34   :  { %2403 = vmatprep.subr.bf16.mxu1 %v3285_v61 }
  0x36   :  { %2373 = vmatpush1.bf16.msra.mxu0 %v3298_v1 }
  0x37   :  { %2405 = vmatpush1.bf16.msra.mxu1 %v3308_v5  ;;  %2375 = vmatprep.subr.bf16.mxu0 %v3318_v8 }
  0x38   :  { %2407 = vmatprep.subr.bf16.mxu1 %v3328_v11 }
  0x3a   :  { %2377 = vmatpush1.bf16.msra.mxu0 %v3341_v15 }
  0x3b   :  { %2409 = vmatpush1.bf16.msra.mxu1 %v3351_v19  ;;  %2379 = vmatprep.subr.bf16.mxu0 %v3361_v24 }
  0x3c   :  { %2411 = vmatprep.subr.bf16.mxu1 %v3371_v28 }
  0x3e   :  { %2381 = vmatpush1.bf16.msra.mxu0 %v3384_v33 }
  0x3f   :  { %2413 = vmatpush1.bf16.msra.mxu1 %v3394_v39  ;;  %2383 = vmatprep.subr.bf16.mxu0 %v3404_v43 }
  0x40   :  { %2415 = vmatprep.subr.bf16.mxu1 %v3414_v46 }
  0x42   :  { %2385 = vmatpush1.bf16.msra.mxu0 %v3427_v52 }
  0x43   :  { %2417 = vmatpush1.bf16.msra.mxu1 %v3437_v56  ;;  %2387 = vmatprep.subr.bf16.mxu0 %v3447_v60 }
  0x44   :  { %2419 = vmatprep.subr.bf16.mxu1 %v3457_v0 }
  0x46   :  { %2389 = vmatpush1.bf16.msra.mxu0 %v3464_v4 }
  0x47   :  { %2421 = vmatpush1.bf16.msra.mxu1 %v3468_v6  ;;  %2423 = vmatprep.subr.bf16.mxu0 %v3147_v17 }
  0x48   :  { %2455 = vmatprep.subr.bf16.mxu1 %v3158_v21 }
  0xfc   :  { %v487_v18 = vpop.f32.mrb[0].mxu0 }
  0xfd   :  { %v2870_v23 = vadd.f32 %v487_v18, %v3526_v14  ;;  %v558_v26 = vpop.f32.mrb[0].mxu1  ;;  %v489_v27 = vpop.f32.mrb[1].mxu0 }
  0xfe   :  { %v2871_v30 = vadd.f32 %v489_v27, %v3530_v16  ;;  %v560_v31 = vpop.f32.mrb[1].mxu1  ;;  %v2886_v48 = vadd.f32 %v558_v26, %v3539_v44 }
  0xff   :  { %v2205_v32 = vmul.f32 -1.442695, %v2870_v23  ;;  %v2887_v41 = vadd.f32 %v560_v31, %v3535_v37 }
 0x100   :  { %v2206_v36 = vmul.f32 -1.442695, %v2871_v30 }
 0x101   :  { %2935 = vpow2.f32 %v2205_v32  ;;  %v2207_v45 = vmul.f32 -1.442695, %v2887_v41 }
 0x102   :  { %2937 = vpow2.f32 %v2206_v36 }
 0x103   :  { %2939 = vpow2.f32 %v2207_v45 }
 0x104   :  { %2941 = vtanh.f32 %v2886_v48 }
 0x10b   :  { %v2936_v49 = vpop.eup %2935 }
 0x10c   :  { %v2938_v51 = vpop.eup %2937  ;;  %v570_v53 = vadd.f32 1.0, %v2936_v49 }
 0x10d   :  { %v576_v55 = vadd.f32 1.0, %v2938_v51  ;;  %v2940_v57 = vpop.eup %2939 }
 0x10e   :  { %2943 = vrcp.f32 %v570_v53  ;;  %v2942_v59 = vpop.eup %2941  ;;  %v583_v7 = vadd.f32 1.0, %v2940_v57 }
 0x10f   :  { %2945 = vrcp.f32 %v576_v55 }
 0x110   :  { %2947 = vrcp.f32 %v583_v7 }
 0x118   :  { %v2944_v62 = vpop.eup %2943 }
 0x119   :  { %v2946_v63 = vpop.eup %2945  ;;  %v587_v2 = vmul.f32 %v2944_v62, %v2942_v59 }
 0x11a   :  { %v586_v18 = vmul.f32 0.0, %v2946_v63  ;;  %v2948_v20 = vpop.eup %2947 }
 0x11c   :  { %v3542_v12 = vadd.f32 %v587_v2, %v586_v18 }
 0x11e   :  { %2949 = vtanh.f32 %v3542_v12 }
 0x128   :  { %v2950_v23 = vpop.eup %2949 }
 0x129   :  { %v3545_v26 = vmul.f32 %v2950_v23, %v2948_v20 }
 0x12b   :  { %664 = vmatmul.mubr.f32.vlgmr.msra.gmra.mrb[2].mxu0 %v3545_v26  ;;  %735 = vmatmul.mubr.f32.vlgmr.msra.gmra.mrb[2].mxu1 %v3545_v26 }
 0x12c   :  { %2425 = vmatpush1.bf16.msra.mxu0 %v3160_v22  ;;  %2457 = vmatpush1.bf16.msra.mxu1 %v3169_v25 }
 0x12d   :  { %2427 = vmatprep.subr.bf16.mxu0 %v3182_v29  ;;  %2459 = vmatprep.subr.bf16.mxu1 %v3198_v34 }
 0x12e   :  { %842 = vmatprep.mubr.f32.mxu0 %v3063_v3  ;;  %913 = vmatprep.mubr.f32.mxu1 %v3063_v3 }
 0x130   :  { %2429 = vmatpush1.bf16.msra.mxu0 %v3200_v35  ;;  %2461 = vmatpush1.bf16.msra.mxu1 %v3210_v38 }
 0x131   :  { %2431 = vmatprep.subr.bf16.mxu0 %v3223_v42  ;;  %2463 = vmatprep.subr.bf16.mxu1 %v3239_v47 }
 0x134   :  { %2433 = vmatpush1.bf16.msra.mxu0 %v3249_v50  ;;  %2465 = vmatpush1.bf16.msra.mxu1 %v3262_v54 }
 0x135   :  { %2435 = vmatprep.subr.bf16.mxu0 %v3275_v58  ;;  %2467 = vmatprep.subr.bf16.mxu1 %v3285_v61 }
 0x138   :  { %2437 = vmatpush1.bf16.msra.mxu0 %v3298_v1  ;;  %2469 = vmatpush1.bf16.msra.mxu1 %v3308_v5 }
 0x139   :  { %2439 = vmatprep.subr.bf16.mxu0 %v3318_v8  ;;  %2471 = vmatprep.subr.bf16.mxu1 %v3328_v11 }
 0x13c   :  { %2441 = vmatpush1.bf16.msra.mxu0 %v3341_v15  ;;  %2473 = vmatpush1.bf16.msra.mxu1 %v3351_v19 }
 0x13d   :  { %2443 = vmatprep.subr.bf16.mxu0 %v3361_v24  ;;  %2475 = vmatprep.subr.bf16.mxu1 %v3371_v28 }
 0x140   :  { %2445 = vmatpush1.bf16.msra.mxu0 %v3384_v33  ;;  %2477 = vmatpush1.bf16.msra.mxu1 %v3394_v39 }
 0x141   :  { %2447 = vmatprep.subr.bf16.mxu0 %v3404_v43  ;;  %2479 = vmatprep.subr.bf16.mxu1 %v3414_v46 }
 0x144   :  { %2449 = vmatpush1.bf16.msra.mxu0 %v3427_v52  ;;  %2481 = vmatpush1.bf16.msra.mxu1 %v3437_v56 }
 0x145   :  { %2451 = vmatprep.subr.bf16.mxu0 %v3447_v60  ;;  %2483 = vmatprep.subr.bf16.mxu1 %v3457_v0 }
 0x148   :  { %2453 = vmatpush1.bf16.msra.mxu0 %v3464_v4  ;;  %2485 = vmatpush1.bf16.msra.mxu1 %v3468_v6 }
 0x149   :  { %2487 = vmatprep.subr.bf16.mxu0 %v3147_v17  ;;  %2519 = vmatprep.subr.bf16.mxu1 %v3158_v21 }
 0x1fe   :  { %v665_v27 = vpop.f32.mrb[2].mxu0  ;;  %v736_v30 = vpop.f32.mrb[2].mxu1 }
 0x1ff   :  { %v2872_v31 = vadd.f32 %v665_v27, %v3526_v14  ;;  %v667_v32 = vpop.f32.mrb[3].mxu0  ;;  %v738_v36 = vpop.f32.mrb[3].mxu1  ;;  %v2888_v51 = vadd.f32 %v736_v30, %v3539_v44 }
 0x200   :  { %v2873_v40 = vadd.f32 %v667_v32, %v3530_v16  ;;  %v2889_v48 = vadd.f32 %v738_v36, %v3535_v37 }
 0x201   :  { %v2208_v41 = vmul.f32 -1.442695, %v2872_v31 }
 0x202   :  { %v2209_v45 = vmul.f32 -1.442695, %v2873_v40  ;;  %v2210_v49 = vmul.f32 -1.442695, %v2889_v48 }
 0x203   :  { %2951 = vpow2.f32 %v2208_v41 }
 0x204   :  { %2953 = vpow2.f32 %v2209_v45 }
 0x205   :  { %2955 = vpow2.f32 %v2210_v49 }
 0x206   :  { %2957 = vtanh.f32 %v2888_v51 }
 0x20d   :  { %v2952_v53 = vpop.eup %2951 }
 0x20e   :  { %v2954_v55 = vpop.eup %2953  ;;  %v748_v57 = vadd.f32 1.0, %v2952_v53 }
 0x20f   :  { %v754_v59 = vadd.f32 1.0, %v2954_v55  ;;  %v2956_v62 = vpop.eup %2955 }
 0x210   :  { %2959 = vrcp.f32 %v748_v57  ;;  %v2958_v63 = vpop.eup %2957  ;;  %v761_v20 = vadd.f32 1.0, %v2956_v62 }
 0x211   :  { %2961 = vrcp.f32 %v754_v59 }
 0x212   :  { %2963 = vrcp.f32 %v761_v20 }
 0x21a   :  { %v2960_v2 = vpop.eup %2959 }
 0x21b   :  { %v2962_v7 = vpop.eup %2961  ;;  %v765_v18 = vmul.f32 %v2960_v2, %v2958_v63 }
 0x21c   :  { %v764_v23 = vmul.f32 %v2962_v7, %v3542_v12  ;;  %v2964_v30 = vpop.eup %2963 }
 0x21e   :  { %v3588_v27 = vadd.f32 %v765_v18, %v764_v23 }
 0x220   :  { %2965 = vtanh.f32 %v3588_v27 }
 0x22a   :  { %v2966_v31 = vpop.eup %2965 }
 0x22b   :  { %v3591_v32 = vmul.f32 %v2966_v31, %v2964_v30 }
 0x22d   :  { %843 = vmatmul.mubr.f32.vlgmr.msra.gmra.mrb[4].mxu0 %v3591_v32  ;;  %914 = vmatmul.mubr.f32.vlgmr.msra.gmra.mrb[4].mxu1 %v3591_v32 }
 0x22e   :  { %2489 = vmatpush1.bf16.msra.mxu0 %v3160_v22  ;;  %2521 = vmatpush1.bf16.msra.mxu1 %v3169_v25 }
 0x22f   :  { %2491 = vmatprep.subr.bf16.mxu0 %v3182_v29  ;;  %2523 = vmatprep.subr.bf16.mxu1 %v3198_v34 }
 0x230   :  { %1021 = vmatprep.mubr.f32.mxu0 %v3063_v3  ;;  %1092 = vmatprep.mubr.f32.mxu1 %v3063_v3 }
 0x232   :  { %2493 = vmatpush1.bf16.msra.mxu0 %v3200_v35  ;;  %2525 = vmatpush1.bf16.msra.mxu1 %v3210_v38 }
 0x233   :  { %2495 = vmatprep.subr.bf16.mxu0 %v3223_v42  ;;  %2527 = vmatprep.subr.bf16.mxu1 %v3239_v47 }
 0x236   :  { %2497 = vmatpush1.bf16.msra.mxu0 %v3249_v50  ;;  %2529 = vmatpush1.bf16.msra.mxu1 %v3262_v54 }
 0x237   :  { %2499 = vmatprep.subr.bf16.mxu0 %v3275_v58  ;;  %2531 = vmatprep.subr.bf16.mxu1 %v3285_v61 }
 0x23a   :  { %2501 = vmatpush1.bf16.msra.mxu0 %v3298_v1  ;;  %2533 = vmatpush1.bf16.msra.mxu1 %v3308_v5 }
 0x23b   :  { %2503 = vmatprep.subr.bf16.mxu0 %v3318_v8  ;;  %2535 = vmatprep.subr.bf16.mxu1 %v3328_v11 }
 0x23e   :  { %2505 = vmatpush1.bf16.msra.mxu0 %v3341_v15  ;;  %2537 = vmatpush1.bf16.msra.mxu1 %v3351_v19 }
 0x23f   :  { %2507 = vmatprep.subr.bf16.mxu0 %v3361_v24  ;;  %2539 = vmatprep.subr.bf16.mxu1 %v3371_v28 }
 0x242   :  { %2509 = vmatpush1.bf16.msra.mxu0 %v3384_v33  ;;  %2541 = vmatpush1.bf16.msra.mxu1 %v3394_v39 }
 0x243   :  { %2511 = vmatprep.subr.bf16.mxu0 %v3404_v43  ;;  %2543 = vmatprep.subr.bf16.mxu1 %v3414_v46 }
 0x246   :  { %2513 = vmatpush1.bf16.msra.mxu0 %v3427_v52  ;;  %2545 = vmatpush1.bf16.msra.mxu1 %v3437_v56 }
 0x247   :  { %2515 = vmatprep.subr.bf16.mxu0 %v3447_v60  ;;  %2547 = vmatprep.subr.bf16.mxu1 %v3457_v0 }
 0x24a   :  { %2517 = vmatpush1.bf16.msra.mxu0 %v3464_v4  ;;  %2549 = vmatpush1.bf16.msra.mxu1 %v3468_v6 }
 0x24b   :  { %2551 = vmatprep.subr.bf16.mxu0 %v3147_v17  ;;  %2583 = vmatprep.subr.bf16.mxu1 %v3158_v21 }
 0x300   :  { %v844_v12 = vpop.f32.mrb[4].mxu0  ;;  %v915_v36 = vpop.f32.mrb[4].mxu1 }
 0x301   :  { %v2874_v40 = vadd.f32 %v844_v12, %v3526_v14  ;;  %v846_v41 = vpop.f32.mrb[5].mxu0  ;;  %v917_v45 = vpop.f32.mrb[5].mxu1  ;;  %v2890_v57 = vadd.f32 %v915_v36, %v3539_v44 }
 0x302   :  { %v2875_v48 = vadd.f32 %v846_v41, %v3530_v16  ;;  %v2891_v53 = vadd.f32 %v917_v45, %v3535_v37 }
 0x303   :  { %v2211_v49 = vmul.f32 -1.442695, %v2874_v40 }
 0x304   :  { %v2212_v51 = vmul.f32 -1.442695, %v2875_v48  ;;  %v2213_v55 = vmul.f32 -1.442695, %v2891_v53 }
 0x305   :  { %2967 = vpow2.f32 %v2211_v49 }
 0x306   :  { %2969 = vpow2.f32 %v2212_v51 }
 0x307   :  { %2971 = vpow2.f32 %v2213_v55 }
 0x308   :  { %2973 = vtanh.f32 %v2890_v57 }
 0x30f   :  { %v2968_v59 = vpop.eup %2967 }
 0x310   :  { %v2970_v62 = vpop.eup %2969  ;;  %v927_v63 = vadd.f32 1.0, %v2968_v59 }
 0x311   :  { %v933_v2 = vadd.f32 1.0, %v2970_v62  ;;  %v2972_v7 = vpop.eup %2971 }
 0x312   :  { %2975 = vrcp.f32 %v927_v63  ;;  %v2974_v18 = vpop.eup %2973  ;;  %v940_v31 = vadd.f32 1.0, %v2972_v7 }
 0x313   :  { %2977 = vrcp.f32 %v933_v2 }
 0x314   :  { %2979 = vrcp.f32 %v940_v31 }
 0x31c   :  { %v2976_v20 = vpop.eup %2975 }
 0x31d   :  { %v2978_v23 = vpop.eup %2977  ;;  %v944_v30 = vmul.f32 %v2976_v20, %v2974_v18 }
 0x31e   :  { %v943_v12 = vmul.f32 %v2978_v23, %v3588_v27  ;;  %v2980_v36 = vpop.eup %2979 }
 0x320   :  { %v3634_v40 = vadd.f32 %v944_v30, %v943_v12 }
 0x322   :  { %2981 = vtanh.f32 %v3634_v40 }
 0x32c   :  { %v2982_v41 = vpop.eup %2981 }
 0x32d   :  { %v3637_v45 = vmul.f32 %v2982_v41, %v2980_v36 }
 0x32f   :  { %1022 = vmatmul.mubr.f32.vlgmr.msra.gmra.mrb[6].mxu0 %v3637_v45  ;;  %1093 = vmatmul.mubr.f32.vlgmr.msra.gmra.mrb[6].mxu1 %v3637_v45 }
 0x330   :  { %2553 = vmatpush1.bf16.msra.mxu0 %v3160_v22  ;;  %2585 = vmatpush1.bf16.msra.mxu1 %v3169_v25 }
 0x331   :  { %2555 = vmatprep.subr.bf16.mxu0 %v3182_v29  ;;  %2587 = vmatprep.subr.bf16.mxu1 %v3198_v34 }
 0x332   :  { %1200 = vmatprep.mubr.f32.mxu0 %v3063_v3  ;;  %1271 = vmatprep.mubr.f32.mxu1 %v3063_v3 }
 0x334   :  { %2557 = vmatpush1.bf16.msra.mxu0 %v3200_v35  ;;  %2589 = vmatpush1.bf16.msra.mxu1 %v3210_v38 }
 0x335   :  { %2559 = vmatprep.subr.bf16.mxu0 %v3223_v42  ;;  %2591 = vmatprep.subr.bf16.mxu1 %v3239_v47 }
 0x338   :  { %2561 = vmatpush1.bf16.msra.mxu0 %v3249_v50  ;;  %2593 = vmatpush1.bf16.msra.mxu1 %v3262_v54 }
 0x339   :  { %2563 = vmatprep.subr.bf16.mxu0 %v3275_v58  ;;  %2595 = vmatprep.subr.bf16.mxu1 %v3285_v61 }
 0x33c   :  { %2565 = vmatpush1.bf16.msra.mxu0 %v3298_v1  ;;  %2597 = vmatpush1.bf16.msra.mxu1 %v3308_v5 }
 0x33d   :  { %2567 = vmatprep.subr.bf16.mxu0 %v3318_v8  ;;  %2599 = vmatprep.subr.bf16.mxu1 %v3328_v11 }
 0x340   :  { %2569 = vmatpush1.bf16.msra.mxu0 %v3341_v15  ;;  %2601 = vmatpush1.bf16.msra.mxu1 %v3351_v19 }
 0x341   :  { %2571 = vmatprep.subr.bf16.mxu0 %v3361_v24  ;;  %2603 = vmatprep.subr.bf16.mxu1 %v3371_v28 }
 0x344   :  { %2573 = vmatpush1.bf16.msra.mxu0 %v3384_v33  ;;  %2605 = vmatpush1.bf16.msra.mxu1 %v3394_v39 }
 0x345   :  { %2575 = vmatprep.subr.bf16.mxu0 %v3404_v43  ;;  %2607 = vmatprep.subr.bf16.mxu1 %v3414_v46 }
 0x348   :  { %2577 = vmatpush1.bf16.msra.mxu0 %v3427_v52  ;;  %2609 = vmatpush1.bf16.msra.mxu1 %v3437_v56 }
 0x349   :  { %2579 = vmatprep.subr.bf16.mxu0 %v3447_v60  ;;  %2611 = vmatprep.subr.bf16.mxu1 %v3457_v0 }
 0x34c   :  { %2581 = vmatpush1.bf16.msra.mxu0 %v3464_v4  ;;  %2613 = vmatpush1.bf16.msra.mxu1 %v3468_v6 }
 0x34d   :  { %2615 = vmatprep.subr.bf16.mxu0 %v3147_v17  ;;  %2647 = vmatprep.subr.bf16.mxu1 %v3158_v21 }
 0x402   :  { %v1023_v27 = vpop.f32.mrb[6].mxu0  ;;  %v1094_v48 = vpop.f32.mrb[6].mxu1 }
 0x403   :  { %v2876_v49 = vadd.f32 %v1023_v27, %v3526_v14  ;;  %v1025_v51 = vpop.f32.mrb[7].mxu0  ;;  %v1096_v53 = vpop.f32.mrb[7].mxu1  ;;  %v2892_v2 = vadd.f32 %v1094_v48, %v3539_v44 }
 0x404   :  { %v2877_v55 = vadd.f32 %v1025_v51, %v3530_v16  ;;  %v2893_v62 = vadd.f32 %v1096_v53, %v3535_v37 }
 0x405   :  { %v2214_v57 = vmul.f32 -1.442695, %v2876_v49 }
 0x406   :  { %v2215_v59 = vmul.f32 -1.442695, %v2877_v55  ;;  %v2216_v63 = vmul.f32 -1.442695, %v2893_v62 }
 0x407   :  { %2983 = vpow2.f32 %v2214_v57 }
 0x408   :  { %2985 = vpow2.f32 %v2215_v59 }
 0x409   :  { %2987 = vpow2.f32 %v2216_v63 }
 0x40a   :  { %2989 = vtanh.f32 %v2892_v2 }
 0x411   :  { %v2984_v7 = vpop.eup %2983 }
 0x412   :  { %v2986_v18 = vpop.eup %2985  ;;  %v1106_v20 = vadd.f32 1.0, %v2984_v7 }
 0x413   :  { %v1112_v23 = vadd.f32 1.0, %v2986_v18  ;;  %v2988_v30 = vpop.eup %2987 }
 0x414   :  { %2991 = vrcp.f32 %v1106_v20  ;;  %v2990_v31 = vpop.eup %2989  ;;  %v1119_v27 = vadd.f32 1.0, %v2988_v30 }
 0x415   :  { %2993 = vrcp.f32 %v1112_v23 }
 0x416   :  { %2995 = vrcp.f32 %v1119_v27 }
 0x41e   :  { %v2992_v12 = vpop.eup %2991 }
 0x41f   :  { %v2994_v36 = vpop.eup %2993  ;;  %v1123_v41 = vmul.f32 %v2992_v12, %v2990_v31 }
 0x420   :  { %v1122_v49 = vmul.f32 %v2994_v36, %v3634_v40  ;;  %v2996_v48 = vpop.eup %2995 }
 0x422   :  { %v3680_v51 = vadd.f32 %v1123_v41, %v1122_v49 }
 0x424   :  { %2997 = vtanh.f32 %v3680_v51 }
 0x42e   :  { %v2998_v53 = vpop.eup %2997 }
 0x42f   :  { %v3683_v55 = vmul.f32 %v2998_v53, %v2996_v48 }
 0x431   :  { %1201 = vmatmul.mubr.f32.vlgmr.msra.gmra.mrb[8].mxu0 %v3683_v55  ;;  %1272 = vmatmul.mubr.f32.vlgmr.msra.gmra.mrb[8].mxu1 %v3683_v55 }
 0x432   :  { %2617 = vmatpush1.bf16.msra.mxu0 %v3160_v22  ;;  %2649 = vmatpush1.bf16.msra.mxu1 %v3169_v25 }
 0x433   :  { %2619 = vmatprep.subr.bf16.mxu0 %v3182_v29  ;;  %2651 = vmatprep.subr.bf16.mxu1 %v3198_v34 }
 0x434   :  { %1379 = vmatprep.mubr.f32.mxu0 %v3063_v3  ;;  %1450 = vmatprep.mubr.f32.mxu1 %v3063_v3 }
 0x436   :  { %2621 = vmatpush1.bf16.msra.mxu0 %v3200_v35  ;;  %2653 = vmatpush1.bf16.msra.mxu1 %v3210_v38 }
 0x437   :  { %2623 = vmatprep.subr.bf16.mxu0 %v3223_v42  ;;  %2655 = vmatprep.subr.bf16.mxu1 %v3239_v47 }
 0x43a   :  { %2625 = vmatpush1.bf16.msra.mxu0 %v3249_v50  ;;  %2657 = vmatpush1.bf16.msra.mxu1 %v3262_v54 }
 0x43b   :  { %2627 = vmatprep.subr.bf16.mxu0 %v3275_v58  ;;  %2659 = vmatprep.subr.bf16.mxu1 %v3285_v61 }
 0x43e   :  { %2629 = vmatpush1.bf16.msra.mxu0 %v3298_v1  ;;  %2661 = vmatpush1.bf16.msra.mxu1 %v3308_v5 }
 0x43f   :  { %2631 = vmatprep.subr.bf16.mxu0 %v3318_v8  ;;  %2663 = vmatprep.subr.bf16.mxu1 %v3328_v11 }
 0x442   :  { %2633 = vmatpush1.bf16.msra.mxu0 %v3341_v15  ;;  %2665 = vmatpush1.bf16.msra.mxu1 %v3351_v19 }
 0x443   :  { %2635 = vmatprep.subr.bf16.mxu0 %v3361_v24  ;;  %2667 = vmatprep.subr.bf16.mxu1 %v3371_v28 }
 0x446   :  { %2637 = vmatpush1.bf16.msra.mxu0 %v3384_v33  ;;  %2669 = vmatpush1.bf16.msra.mxu1 %v3394_v39 }
 0x447   :  { %2639 = vmatprep.subr.bf16.mxu0 %v3404_v43  ;;  %2671 = vmatprep.subr.bf16.mxu1 %v3414_v46 }
 0x44a   :  { %2641 = vmatpush1.bf16.msra.mxu0 %v3427_v52  ;;  %2673 = vmatpush1.bf16.msra.mxu1 %v3437_v56 }
 0x44b   :  { %2643 = vmatprep.subr.bf16.mxu0 %v3447_v60  ;;  %2675 = vmatprep.subr.bf16.mxu1 %v3457_v0 }
 0x44e   :  { %2645 = vmatpush1.bf16.msra.mxu0 %v3464_v4  ;;  %2677 = vmatpush1.bf16.msra.mxu1 %v3468_v6 }
 0x44f   :  { %2679 = vmatprep.subr.bf16.mxu0 %v3147_v17  ;;  %2711 = vmatprep.subr.bf16.mxu1 %v3158_v21 }
 0x504   :  { %v1202_v40 = vpop.f32.mrb[8].mxu0  ;;  %v1273_v57 = vpop.f32.mrb[8].mxu1 }
 0x505   :  { %v2878_v59 = vadd.f32 %v1202_v40, %v3526_v14  ;;  %v1204_v62 = vpop.f32.mrb[9].mxu0  ;;  %v1275_v63 = vpop.f32.mrb[9].mxu1  ;;  %v2894_v30 = vadd.f32 %v1273_v57, %v3539_v44 }
 0x506   :  { %v2879_v2 = vadd.f32 %v1204_v62, %v3530_v16  ;;  %v2895_v20 = vadd.f32 %v1275_v63, %v3535_v37 }
 0x507   :  { %v2217_v7 = vmul.f32 -1.442695, %v2878_v59 }
 0x508   :  { %v2218_v18 = vmul.f32 -1.442695, %v2879_v2  ;;  %v2219_v23 = vmul.f32 -1.442695, %v2895_v20 }
 0x509   :  { %2999 = vpow2.f32 %v2217_v7 }
 0x50a   :  { %3001 = vpow2.f32 %v2218_v18 }
 0x50b   :  { %3003 = vpow2.f32 %v2219_v23 }
 0x50c   :  { %3005 = vtanh.f32 %v2894_v30 }
 0x513   :  { %v3000_v31 = vpop.eup %2999 }
 0x514   :  { %v3002_v12 = vpop.eup %3001  ;;  %v1285_v36 = vadd.f32 1.0, %v3000_v31 }
 0x515   :  { %v1291_v41 = vadd.f32 1.0, %v3002_v12  ;;  %v3004_v27 = vpop.eup %3003 }
 0x516   :  { %3007 = vrcp.f32 %v1285_v36  ;;  %v3006_v49 = vpop.eup %3005  ;;  %v1298_v59 = vadd.f32 1.0, %v3004_v27 }
 0x517   :  { %3009 = vrcp.f32 %v1291_v41 }
 0x518   :  { %3011 = vrcp.f32 %v1298_v59 }
 0x520   :  { %v3008_v48 = vpop.eup %3007 }
 0x521   :  { %v3010_v53 = vpop.eup %3009  ;;  %v1302_v40 = vmul.f32 %v3008_v48, %v3006_v49 }
 0x522   :  { %v1301_v62 = vmul.f32 %v3010_v53, %v3680_v51  ;;  %v3012_v57 = vpop.eup %3011 }
 0x524   :  { %v3726_v63 = vadd.f32 %v1302_v40, %v1301_v62 }
 0x526   :  { %3013 = vtanh.f32 %v3726_v63 }
 0x530   :  { %v3014_v2 = vpop.eup %3013 }
 0x531   :  { %v3729_v7 = vmul.f32 %v3014_v2, %v3012_v57 }
 0x533   :  { %1380 = vmatmul.mubr.f32.vlgmr.msra.gmra.mrb[10].mxu0 %v3729_v7  ;;  %1451 = vmatmul.mubr.f32.vlgmr.msra.gmra.mrb[10].mxu1 %v3729_v7 }
 0x534   :  { %2681 = vmatpush1.bf16.msra.mxu0 %v3160_v22  ;;  %2713 = vmatpush1.bf16.msra.mxu1 %v3169_v25 }
 0x535   :  { %2683 = vmatprep.subr.bf16.mxu0 %v3182_v29  ;;  %2715 = vmatprep.subr.bf16.mxu1 %v3198_v34 }
 0x536   :  { %1558 = vmatprep.mubr.f32.mxu0 %v3063_v3  ;;  %1629 = vmatprep.mubr.f32.mxu1 %v3063_v3 }
 0x538   :  { %2685 = vmatpush1.bf16.msra.mxu0 %v3200_v35  ;;  %2717 = vmatpush1.bf16.msra.mxu1 %v3210_v38 }
 0x539   :  { %2687 = vmatprep.subr.bf16.mxu0 %v3223_v42  ;;  %2719 = vmatprep.subr.bf16.mxu1 %v3239_v47 }
 0x53c   :  { %2689 = vmatpush1.bf16.msra.mxu0 %v3249_v50  ;;  %2721 = vmatpush1.bf16.msra.mxu1 %v3262_v54 }
 0x53d   :  { %2691 = vmatprep.subr.bf16.mxu0 %v3275_v58  ;;  %2723 = vmatprep.subr.bf16.mxu1 %v3285_v61 }
 0x540   :  { %2693 = vmatpush1.bf16.msra.mxu0 %v3298_v1  ;;  %2725 = vmatpush1.bf16.msra.mxu1 %v3308_v5 }
 0x541   :  { %2695 = vmatprep.subr.bf16.mxu0 %v3318_v8  ;;  %2727 = vmatprep.subr.bf16.mxu1 %v3328_v11 }
 0x544   :  { %2697 = vmatpush1.bf16.msra.mxu0 %v3341_v15  ;;  %2729 = vmatpush1.bf16.msra.mxu1 %v3351_v19 }
 0x545   :  { %2699 = vmatprep.subr.bf16.mxu0 %v3361_v24  ;;  %2731 = vmatprep.subr.bf16.mxu1 %v3371_v28 }
 0x548   :  { %2701 = vmatpush1.bf16.msra.mxu0 %v3384_v33  ;;  %2733 = vmatpush1.bf16.msra.mxu1 %v3394_v39 }
 0x549   :  { %2703 = vmatprep.subr.bf16.mxu0 %v3404_v43  ;;  %2735 = vmatprep.subr.bf16.mxu1 %v3414_v46 }
 0x54c   :  { %2705 = vmatpush1.bf16.msra.mxu0 %v3427_v52  ;;  %2737 = vmatpush1.bf16.msra.mxu1 %v3437_v56 }
 0x54d   :  { %2707 = vmatprep.subr.bf16.mxu0 %v3447_v60  ;;  %2739 = vmatprep.subr.bf16.mxu1 %v3457_v0 }
 0x550   :  { %2709 = vmatpush1.bf16.msra.mxu0 %v3464_v4  ;;  %2741 = vmatpush1.bf16.msra.mxu1 %v3468_v6 }
 0x551   :  { %2743 = vmatprep.subr.bf16.mxu0 %v3147_v17  ;;  %2775 = vmatprep.subr.bf16.mxu1 %v3158_v21 }
 0x606   :  { %v1381_v51 = vpop.f32.mrb[10].mxu0  ;;  %v1452_v18 = vpop.f32.mrb[10].mxu1 }
 0x607   :  { %v2880_v20 = vadd.f32 %v1381_v51, %v3526_v14  ;;  %v1383_v23 = vpop.f32.mrb[11].mxu0  ;;  %v1454_v30 = vpop.f32.mrb[11].mxu1  ;;  %v2896_v49 = vadd.f32 %v1452_v18, %v3539_v44 }
 0x608   :  { %v2881_v31 = vadd.f32 %v1383_v23, %v3530_v16  ;;  %v2897_v41 = vadd.f32 %v1454_v30, %v3535_v37 }
 0x609   :  { %v2220_v12 = vmul.f32 -1.442695, %v2880_v20 }
 0x60a   :  { %v2221_v36 = vmul.f32 -1.442695, %v2881_v31  ;;  %v2222_v27 = vmul.f32 -1.442695, %v2897_v41 }
 0x60b   :  { %3015 = vpow2.f32 %v2220_v12 }
 0x60c   :  { %3017 = vpow2.f32 %v2221_v36 }
 0x60d   :  { %3019 = vpow2.f32 %v2222_v27 }
 0x60e   :  { %3021 = vtanh.f32 %v2896_v49  ;;  %v1857_v49 = vld [vmem:[%s4093_s4 + $0x20] sm:$0xff] }
 0x615   :  { %v3016_v17 = vpop.eup %3015 }
 0x616   :  { %v3018_v48 = vpop.eup %3017  ;;  %v1464_v21 = vadd.f32 1.0, %v3016_v17  ;;  %v1859_v17 = vld [vmem:[%s4093_s4 + $0x30] sm:$0xff] }
 0x617   :  { %v1470_v53 = vadd.f32 1.0, %v3018_v48  ;;  %v3020_v40 = vpop.eup %3019  ;;  %v1862_v48 = vld [vmem:[%s4093_s4 + $0x48] sm:$0xff] }
 0x618   :  { %3023 = vrcp.f32 %v1464_v21  ;;  %v3022_v59 = vpop.eup %3021  ;;  %v1477_v51 = vadd.f32 1.0, %v3020_v40  ;;  %v1864_v21 = vld [vmem:[%s4093_s4 + $0x58] sm:$0xff] }
 0x619   :  { %3025 = vrcp.f32 %v1470_v53  ;;  %v2812_v53 = vpack.c.bf16 %v1859_v17, %v1857_v49  ;;  %v2814_v40 = vpack.c.bf16 %v1864_v21, %v1862_v48  ;;  %v2048_v17 = vld [vmem:[%s4094_s6 + $0xb0] sm:$0xff]  ;;  %v2049_v48 = vld [vmem:[%s4094_s6 + $0xb8] sm:$0xff] }
 0x61a   :  { %3027 = vrcp.f32 %v1477_v51  ;;  %v2850_v21 = vpack.c.bf16 %v2049_v48, %v2048_v17 }
 0x622   :  { %v3024_v62 = vpop.eup %3023 }
 0x623   :  { %v3026_v57 = vpop.eup %3025  ;;  %v1481_v2 = vmul.f32 %v3024_v62, %v3022_v59  ;;  %v1861_v59 = vld [vmem:[%s4093_s4 + $0x40] sm:$0xff]  ;;  %v1863_v62 = vld [vmem:[%s4093_s4 + $0x50] sm:$0xff] }
 0x624   :  { %v1480_v20 = vmul.f32 %v3026_v57, %v3726_v63  ;;  %v3028_v18 = vpop.eup %3027  ;;  %v1866_v57 = vld [vmem:[%s4093_s4 + $0x68] sm:$0xff]  ;;  %v2816_v51 = vpack.c.bf16 %v1863_v62, %v1861_v59  ;;  %v2050_v62 = vld [vmem:[%s4094_s6 + $0xc0] sm:$0xff] }
 0x626   :  { %v3772_v23 = vadd.f32 %v1481_v2, %v1480_v20  ;;  %v1868_v2 = vld [vmem:[%s4093_s4 + $0x78] sm:$0xff] }
 0x627   :  { %v2818_v20 = vpack.c.bf16 %v1868_v2, %v1866_v57  ;;  %v2051_v57 = vld [vmem:[%s4094_s6 + $0xc8] sm:$0xff] }
 0x628   :  { %3029 = vtanh.f32 %v3772_v23  ;;  %v2854_v2 = vpack.c.bf16 %v2051_v57, %v2050_v62 }
 0x632   :  { %v3030_v30 = vpop.eup %3029 }
 0x633   :  { %v3775_v31 = vmul.f32 %v3030_v30, %v3028_v18  ;;  %v1867_v18 = vld [vmem:[%s4093_s4 + $0x70] sm:$0xff]  ;;  %v1870_v30 = vld [vmem:[%s4093_s4 + $0x88] sm:$0xff] }
 0x635   :  { %1559 = vmatmul.mubr.f32.vlgmr.msra.gmra.mrb[12].mxu0 %v3775_v31  ;;  %1630 = vmatmul.mubr.f32.vlgmr.msra.gmra.mrb[12].mxu1 %v3775_v31 }
 0x636   :  { %2745 = vmatpush1.bf16.msra.mxu0 %v3160_v22  ;;  %2777 = vmatpush1.bf16.msra.mxu1 %v3169_v25  ;;  %v1854_v22 = vld [vmem:[%s4093_s4 + $0x8] sm:$0xff]  ;;  %v1856_v25 = vld [vmem:[%s4093_s4 + $0x18] sm:$0xff] }
 0x637   :  { %2747 = vmatprep.subr.bf16.mxu0 %v3182_v29  ;;  %2779 = vmatprep.subr.bf16.mxu1 %v3198_v34  ;;  %v2806_v29 = vpack.c.bf16 %v1856_v25, %v1854_v22  ;;  %v1872_v22 = vld [vmem:[%s4093_s4 + $0x98] sm:$0xff] }
 0x638   :  { %1737 = vmatprep.mubr.f32.mxu0 %v3063_v3  ;;  %1808 = vmatprep.mubr.f32.mxu1 %v3063_v3 }
 0x63a   :  { %2749 = vmatpush1.bf16.msra.mxu0 %v3200_v35  ;;  %2781 = vmatpush1.bf16.msra.mxu1 %v3210_v38 }
 0x63b   :  { %2751 = vmatprep.subr.bf16.mxu0 %v3223_v42  ;;  %2783 = vmatprep.subr.bf16.mxu1 %v3239_v47 }
 0x63e   :  { %2753 = vmatpush1.bf16.msra.mxu0 %v3249_v50  ;;  %2785 = vmatpush1.bf16.msra.mxu1 %v3262_v54 }
 0x63f   :  { %2755 = vmatprep.subr.bf16.mxu0 %v3275_v58  ;;  %2787 = vmatprep.subr.bf16.mxu1 %v3285_v61 }
 0x642   :  { %2757 = vmatpush1.bf16.msra.mxu0 %v3298_v1  ;;  %2789 = vmatpush1.bf16.msra.mxu1 %v3308_v5 }
 0x643   :  { %2759 = vmatprep.subr.bf16.mxu0 %v3318_v8  ;;  %2791 = vmatprep.subr.bf16.mxu1 %v3328_v11 }
 0x646   :  { %2761 = vmatpush1.bf16.msra.mxu0 %v3341_v15  ;;  %2793 = vmatpush1.bf16.msra.mxu1 %v3351_v19 }
 0x647   :  { %2763 = vmatprep.subr.bf16.mxu0 %v3361_v24  ;;  %2795 = vmatprep.subr.bf16.mxu1 %v3371_v28 }
 0x64a   :  { %2765 = vmatpush1.bf16.msra.mxu0 %v3384_v33  ;;  %2797 = vmatpush1.bf16.msra.mxu1 %v3394_v39 }
 0x64b   :  { %2767 = vmatprep.subr.bf16.mxu0 %v3404_v43  ;;  %2799 = vmatprep.subr.bf16.mxu1 %v3414_v46 }
 0x64e   :  { %2769 = vmatpush1.bf16.msra.mxu0 %v3427_v52  ;;  %2801 = vmatpush1.bf16.msra.mxu1 %v3437_v56 }
 0x64f   :  { %2771 = vmatprep.subr.bf16.mxu0 %v3447_v60  ;;  %2803 = vmatprep.subr.bf16.mxu1 %v3457_v0  ;;  %v1853_v60 = vld [vmem:[%s4093_s4] sm:$0xff]  ;;  %v1855_v0 = vld [vmem:[%s4093_s4 + $0x10] sm:$0xff] }
 0x650   :  { %v2808_v36 = vpack.c.bf16 %v1855_v0, %v1853_v60  ;;  %v2028_v0 = vld [vmem:[%s4094_s6 + $0x10] sm:$0xff] }
 0x652   :  { %2773 = vmatpush1.bf16.msra.mxu0 %v3464_v4  ;;  %2805 = vmatpush1.bf16.msra.mxu1 %v3468_v6  ;;  %v1858_v4 = vld [vmem:[%s4093_s4 + $0x28] sm:$0xff]  ;;  %v1860_v6 = vld [vmem:[%s4093_s4 + $0x38] sm:$0xff] }
 0x653   :  { %2807 = vmatprep.subr.bf16.mxu0 %v2806_v29  ;;  %v2810_v27 = vpack.c.bf16 %v1860_v6, %v1858_v4  ;;  %v2822_v29 = vpack.c.bf16 %v1872_v22, %v1870_v30  ;;  %v2029_v4 = vld [vmem:[%s4094_s6 + $0x18] sm:$0xff] }
 0x654   :  { %v2844_v6 = vpack.c.bf16 %v2029_v4, %v2028_v0  ;;  %v2053_v30 = vld [vmem:[%s4094_s6 + $0xd8] sm:$0xff] }
 0x708   :  { %v1560_v34 = vpop.f32.mrb[12].mxu0  ;;  %v1631_v35 = vpop.f32.mrb[12].mxu1 }
 0x709   :  { %v2882_v38 = vadd.f32 %v1560_v34, %v3526_v14  ;;  %v1562_v42 = vpop.f32.mrb[13].mxu0  ;;  %v1633_v47 = vpop.f32.mrb[13].mxu1  ;;  %v2898_v5 = vadd.f32 %v1631_v35, %v3539_v44  ;;  %v1869_v34 = vld [vmem:[%s4093_s4 + $0x80] sm:$0xff]  ;;  %v1871_v35 = vld [vmem:[%s4093_s4 + $0x90] sm:$0xff] }
 0x70a   :  { %v2883_v50 = vadd.f32 %v1562_v42, %v3530_v16  ;;  %v2899_v61 = vadd.f32 %v1633_v47, %v3535_v37  ;;  %v1876_v42 = vld [vmem:[%s4093_s4 + $0xb8] sm:$0xff]  ;;  %v2824_v47 = vpack.c.bf16 %v1871_v35, %v1869_v34  ;;  %v2054_v35 = vld [vmem:[%s4094_s6 + $0xe0] sm:$0xff] }
 0x70b   :  { %v2223_v54 = vmul.f32 -1.442695, %v2882_v38  ;;  %v1874_v38 = vld [vmem:[%s4093_s4 + $0xa8] sm:$0xff] }
 0x70c   :  { %v2224_v58 = vmul.f32 -1.442695, %v2883_v50  ;;  %v2225_v1 = vmul.f32 -1.442695, %v2899_v61  ;;  %v2826_v50 = vpack.c.bf16 %v1876_v42, %v1874_v38  ;;  %v1878_v61 = vld [vmem:[%s4093_s4 + $0xc8] sm:$0xff] }
 0x70d   :  { %3031 = vpow2.f32 %v2223_v54  ;;  %v1873_v54 = vld [vmem:[%s4093_s4 + $0xa0] sm:$0xff]  ;;  %v2055_v38 = vld [vmem:[%s4094_s6 + $0xe8] sm:$0xff] }
 0x70e   :  { %3033 = vpow2.f32 %v2224_v58  ;;  %v1875_v58 = vld [vmem:[%s4093_s4 + $0xb0] sm:$0xff]  ;;  %v2862_v42 = vpack.c.bf16 %v2055_v38, %v2054_v35 }
 0x70f   :  { %3035 = vpow2.f32 %v2225_v1  ;;  %v1880_v1 = vld [vmem:[%s4093_s4 + $0xd8] sm:$0xff] }
 0x710   :  { %3037 = vtanh.f32 %v2898_v5  ;;  %v2828_v5 = vpack.c.bf16 %v1875_v58, %v1873_v54  ;;  %v2056_v58 = vld [vmem:[%s4094_s6 + $0xf0] sm:$0xff] }
 0x717   :  { %v3032_v8 = vpop.eup %3031 }
 0x718   :  { %v3034_v11 = vpop.eup %3033  ;;  %v1643_v15 = vadd.f32 1.0, %v3032_v8  ;;  %v2830_v8 = vpack.c.bf16 %v1880_v1, %v1878_v61  ;;  %v2057_v61 = vld [vmem:[%s4094_s6 + $0xf8] sm:$0xff] }
 0x719   :  { %v1649_v19 = vadd.f32 1.0, %v3034_v11  ;;  %v3036_v24 = vpop.eup %3035  ;;  %v1877_v11 = vld [vmem:[%s4093_s4 + $0xc0] sm:$0xff]  ;;  %v2866_v1 = vpack.c.bf16 %v2057_v61, %v2056_v58 }
 0x71a   :  { %3039 = vrcp.f32 %v1643_v15  ;;  %v3038_v28 = vpop.eup %3037  ;;  %v1656_v46 = vadd.f32 1.0, %v3036_v24  ;;  %v1879_v15 = vld [vmem:[%s4093_s4 + $0xd0] sm:$0xff]  ;;  %v1884_v24 = vld [vmem:[%s4093_s4 + $0xf8] sm:$0xff] }
 0x71b   :  { %3041 = vrcp.f32 %v1649_v19  ;;  %v1882_v19 = vld [vmem:[%s4093_s4 + $0xe8] sm:$0xff] }
 0x71c   :  { %3043 = vrcp.f32 %v1656_v46 }
 0x724   :  { %v3040_v33 = vpop.eup %3039 }
 0x725   :  { %v3042_v39 = vpop.eup %3041  ;;  %v1660_v43 = vmul.f32 %v3040_v33, %v3038_v28  ;;  %v2832_v28 = vpack.c.bf16 %v1879_v15, %v1877_v11  ;;  %v2834_v33 = vpack.c.bf16 %v1884_v24, %v1882_v19 }
 0x726   :  { %v1659_v52 = vmul.f32 %v3042_v39, %v3772_v23  ;;  %v3044_v63 = vpop.eup %3043  ;;  %v1865_v23 = vld [vmem:[%s4093_s4 + $0x60] sm:$0xff] }
 0x727   :  { %v2820_v25 = vpack.c.bf16 %v1867_v18, %v1865_v23  ;;  %v1881_v39 = vld [vmem:[%s4093_s4 + $0xe0] sm:$0xff]  ;;  %v2052_v18 = vld [vmem:[%s4094_s6 + $0xd0] sm:$0xff] }
 0x728   :  { %v3822_v56 = vadd.f32 %v1660_v43, %v1659_v52  ;;  %v1883_v43 = vld [vmem:[%s4093_s4 + $0xf0] sm:$0xff]  ;;  %v2045_v52 = vld [vmem:[%s4094_s6 + $0x98] sm:$0xff]  ;;  %v2858_v22 = vpack.c.bf16 %v2053_v30, %v2052_v18 }
 0x729   :  { %v2836_v46 = vpack.c.bf16 %v1883_v43, %v1881_v39 }
 0x72a   :  { %3045 = vtanh.f32 %v3822_v56 }
 0x734   :  { %v3046_v12 = vpop.eup %3045 }
 0x735   :  { %v3837_v41 = vmul.f32 %v3046_v12, %v3044_v63  ;;  %v2046_v63 = vld [vmem:[%s4094_s6 + $0xa0] sm:$0xff]  ;;  %v2047_v12 = vld [vmem:[%s4094_s6 + $0xa8] sm:$0xff] }
 0x737   :  { %1738 = vmatmul.mubr.f32.vlgmr.msra.gmra.mrb[14].mxu0 %v3837_v41  ;;  %1809 = vmatmul.mubr.f32.vlgmr.msra.gmra.mrb[14].mxu1 %v3837_v41 }
 0x738   :  { %2809 = vmatpush1.bf16.msra.mxu0 %v2808_v36  ;;  %1961 = vmatprep.mubr.f32.mxu0 %v3063_v3  ;;  %v2846_v36 = vpack.c.bf16 %v2047_v12, %v2046_v63 }
 0x739   :  { %2811 = vmatprep.subr.bf16.mxu0 %v2810_v27  ;;  %v2031_v27 = vld [vmem:[%s4094_s6 + $0x28] sm:$0xff] }
 0x73c   :  { %2813 = vmatpush1.bf16.msra.mxu0 %v2812_v53  ;;  %v2032_v53 = vld [vmem:[%s4094_s6 + $0x30] sm:$0xff] }
 0x73d   :  { %2815 = vmatprep.subr.bf16.mxu0 %v2814_v40  ;;  %v2033_v40 = vld [vmem:[%s4094_s6 + $0x38] sm:$0xff] }
 0x73e   :  { %v2852_v59 = vpack.c.bf16 %v2033_v40, %v2032_v53 }
 0x740   :  { %2817 = vmatpush1.bf16.msra.mxu0 %v2816_v51  ;;  %v2034_v51 = vld [vmem:[%s4094_s6 + $0x40] sm:$0xff] }
 0x741   :  { %2819 = vmatprep.subr.bf16.mxu0 %v2818_v20  ;;  %v2035_v20 = vld [vmem:[%s4094_s6 + $0x48] sm:$0xff] }
 0x742   :  { %v2856_v23 = vpack.c.bf16 %v2035_v20, %v2034_v51 }
 0x744   :  { %2821 = vmatpush1.bf16.msra.mxu0 %v2820_v25  ;;  %v2036_v25 = vld [vmem:[%s4094_s6 + $0x50] sm:$0xff] }
 0x745   :  { %2823 = vmatprep.subr.bf16.mxu0 %v2822_v29  ;;  %v2037_v29 = vld [vmem:[%s4094_s6 + $0x58] sm:$0xff] }
 0x746   :  { %v2860_v34 = vpack.c.bf16 %v2037_v29, %v2036_v25 }
 0x748   :  { %2825 = vmatpush1.bf16.msra.mxu0 %v2824_v47  ;;  %v2038_v47 = vld [vmem:[%s4094_s6 + $0x60] sm:$0xff] }
 0x749   :  { %2827 = vmatprep.subr.bf16.mxu0 %v2826_v50  ;;  %v2039_v50 = vld [vmem:[%s4094_s6 + $0x68] sm:$0xff] }
 0x74a   :  { %v2864_v54 = vpack.c.bf16 %v2039_v50, %v2038_v47 }
 0x74c   :  { %2829 = vmatpush1.bf16.msra.mxu0 %v2828_v5  ;;  %v2040_v5 = vld [vmem:[%s4094_s6 + $0x70] sm:$0xff] }
 0x74d   :  { %2831 = vmatprep.subr.bf16.mxu0 %v2830_v8  ;;  %v2041_v8 = vld [vmem:[%s4094_s6 + $0x78] sm:$0xff] }
 0x74e   :  { %v2868_v11 = vpack.c.bf16 %v2041_v8, %v2040_v5 }
 0x750   :  { %2833 = vmatpush1.bf16.msra.mxu0 %v2832_v28 }
 0x751   :  { %2835 = vmatprep.subr.bf16.mxu0 %v2834_v33 }
 0x754   :  { %2837 = vmatpush1.bf16.msra.mxu0 %v2836_v46 }
 0x757   :  { %1962 = vmatmul.mubr.f32.vlgmr.msra.gmra.mrb[16].mxu0 %v3545_v26  ;;  %v2042_v26 = vld [vmem:[%s4094_s6 + $0x80] sm:$0xff] }
 0x758   :  { %1967 = vmatprep.mubr.f32.mxu0 %v3063_v3 }
 0x75b   :  { %1968 = vmatmul.mubr.f32.gmra.mrb[18].mxu0 %v3591_v32  ;;  %v2043_v32 = vld [vmem:[%s4094_s6 + $0x88] sm:$0xff] }
 0x75c   :  { %1973 = vmatprep.mubr.f32.mxu0 %v3063_v3 }
 0x75f   :  { %1974 = vmatmul.mubr.f32.gmra.mrb[20].mxu0 %v3637_v45  ;;  %v2838_v45 = vpack.c.bf16 %v2043_v32, %v2042_v26 }
 0x760   :  { %1979 = vmatprep.mubr.f32.mxu0 %v3063_v3 }
 0x761   :  { %2839 = vmatprep.subr.bf16.mxu1 %v2838_v45 }
 0x763   :  { %1980 = vmatmul.mubr.f32.gmra.mrb[22].mxu0 %v3683_v55  ;;  %v2026_v55 = vld [vmem:[%s4094_s6] sm:$0xff] }
 0x764   :  { %1985 = vmatprep.mubr.f32.mxu0 %v3063_v3 }
 0x767   :  { %1986 = vmatmul.mubr.f32.gmra.mrb[24].mxu0 %v3729_v7  ;;  %v2027_v7 = vld [vmem:[%s4094_s6 + $0x8] sm:$0xff] }
 0x768   :  { %1991 = vmatprep.mubr.f32.mxu0 %v3063_v3 }
 0x76b   :  { %1992 = vmatmul.mubr.f32.gmra.mrb[26].mxu0 %v3775_v31  ;;  %v2840_v31 = vpack.c.bf16 %v2027_v7, %v2026_v55 }
 0x76c   :  { %1997 = vmatprep.mubr.f32.mxu0 %v3063_v3 }
 0x76d   :  { %2841 = vmatpush3.bf16.msra.mxu1 %v2840_v31 }
 0x76f   :  { %1998 = vmatmul.mubr.f32.gmra.mrb[28].mxu0 %v3837_v41  ;;  %v2030_v41 = vld [vmem:[%s4094_s6 + $0x20] sm:$0xff] }
 0x770   :  { %2003 = vmatprep.mubr.f32.mxu0 %v3063_v3  ;;  %v2044_v3 = vld [vmem:[%s4094_s6 + $0x90] sm:$0xff]  ;;  %v2848_v49 = vpack.c.bf16 %v2031_v27, %v2030_v41 }
 0x771   :  { %v2842_v60 = vpack.c.bf16 %v2045_v52, %v2044_v3 }
 0x773   :  { %2843 = vmatprep.subr.bf16.mxu1 %v2842_v60 }
 0x774   :  { %2845 = vmatpush3.bf16.msra.mxu1 %v2844_v6 }
 0x775   :  { %2847 = vmatprep.subr.bf16.mxu1 %v2846_v36 }
 0x778   :  { %2849 = vmatpush3.bf16.msra.mxu1 %v2848_v49 }
 0x779   :  { %2851 = vmatprep.subr.bf16.mxu1 %v2850_v21 }
 0x77c   :  { %2853 = vmatpush3.bf16.msra.mxu1 %v2852_v59 }
 0x77d   :  { %2855 = vmatprep.subr.bf16.mxu1 %v2854_v2 }
 0x780   :  { %2857 = vmatpush3.bf16.msra.mxu1 %v2856_v23 }
 0x781   :  { %2859 = vmatprep.subr.bf16.mxu1 %v2858_v22 }
 0x784   :  { %2861 = vmatpush3.bf16.msra.mxu1 %v2860_v34 }
 0x785   :  { %2863 = vmatprep.subr.bf16.mxu1 %v2862_v42 }
 0x788   :  { %2865 = vmatpush3.bf16.msra.mxu1 %v2864_v54 }
 0x789   :  { %2867 = vmatprep.subr.bf16.mxu1 %v2866_v1 }
 0x78c   :  { %2869 = vmatpush3.bf16.msra.mxu1 %v2868_v11 }
 0x80a   :  { %v1739_v15 = vpop.f32.mrb[14].mxu0  ;;  %v1810_v19 = vpop.f32.mrb[14].mxu1 }
 0x80b   :  { %v2884_v24 = vadd.f32 %v1739_v15, %v3526_v14  ;;  %v1741_v28 = vpop.f32.mrb[15].mxu0  ;;  %v1812_v33 = vpop.f32.mrb[15].mxu1  ;;  %v2900_v45 = vadd.f32 %v1810_v19, %v3539_v44 }
 0x80c   :  { %v2885_v39 = vadd.f32 %v1741_v28, %v3530_v16  ;;  %v2901_v26 = vadd.f32 %v1812_v33, %v3535_v37  ;;  %v1885_v16 = vld [vmem:[%s4095_s5] sm:$0x3] }
 0x80d   :  { %v2226_v43 = vmul.f32 -1.442695, %v2884_v24  ;;  %v4039_v44 = vrot.slane %v1885_v16, %v49_v10  ;;  %v4044_v63 = vrot.slane %v1885_v16, %v53_v13 }
 0x80e   :  { %v2227_v46 = vmul.f32 -1.442695, %v2885_v39  ;;  %v2228_v32 = vmul.f32 -1.442695, %v2901_v26  ;;  %v2229_v26 = vld [vmem:[%s4096_s7] ss:$0 sm:$0xff] }
 0x80f   :  { %3047 = vpow2.f32 %v2226_v43 }
 0x810   :  { %3049 = vpow2.f32 %v2227_v46 }
 0x811   :  { %3051 = vpow2.f32 %v2228_v32 }
 0x812   :  { %3053 = vtanh.f32 %v2900_v45 }
 0x819   :  { %v3048_v55 = vpop.eup %3047 }
 0x81a   :  { %v3050_v7 = vpop.eup %3049  ;;  %v1822_v31 = vadd.f32 1.0, %v3048_v55 }
 0x81b   :  { %v1828_v3 = vadd.f32 1.0, %v3050_v7  ;;  %v3052_v14 = vpop.eup %3051 }
 0x81c   :  { %3055 = vrcp.f32 %v1822_v31  ;;  %v3054_v52 = vpop.eup %3053  ;;  %v1835_v4 = vadd.f32 1.0, %v3052_v14 }
 0x81d   :  { %3057 = vrcp.f32 %v1828_v3 }
 0x81e   :  { %3059 = vrcp.f32 %v1835_v4 }
 0x826   :  { %v3056_v60 = vpop.eup %3055 }
 0x827   :  { %v3058_v0 = vpop.eup %3057  ;;  %v1839_v37 = vmul.f32 %v3056_v60, %v3054_v52 }
 0x828   :  { %v1838_v6 = vmul.f32 %v3058_v0, %v3822_v56  ;;  %v3060_v2 = vpop.eup %3059 }
 0x82a   :  { %v1963_v12 = vpop.f32.mrb[16].mxu0  ;;  %v1840_v36 = vadd.f32 %v1839_v37, %v1838_v6 }
 0x82b   :  { %v1964_v41 = vadd.f32 %v1963_v12, %v4039_v44  ;;  %v1965_v27 = vpop.f32.mrb[17].mxu0 }
 0x82c   :  { %v1966_v49 = vadd.f32 %v1965_v27, %v4044_v63  ;;  %3061 = vtanh.f32 %v1840_v36 }
 0x82d   :  { %v2010_v21 = vmax.f32 %v1964_v41, 0.0 }
 0x82e   :  { %v2011_v17 = vmax.f32 %v1966_v49, 0.0  ;;  %v1969_v48 = vpop.f32.mrb[18].mxu0 }
 0x82f   :  { %v1970_v10 = vadd.f32 %v1969_v48, %v4039_v44  ;;  %v1971_v53 = vpop.f32.mrb[19].mxu0 }
 0x830   :  { %v1972_v56 = vadd.f32 %v1971_v53, %v4044_v63  ;;  %2129 = vmatprep.mubr.f32.mxu1 %v2011_v17 }
 0x831   :  { %2130 = vmatmul.mubr.f32.vlgmr.msra.gmra.mrb[16].mxu1 %v2010_v21  ;;  %v2012_v40 = vmax.f32 %v1970_v10, 0.0 }
 0x832   :  { %v2013_v9 = vmax.f32 %v1972_v56, 0.0  ;;  %v1975_v13 = vpop.f32.mrb[20].mxu0 }
 0x833   :  { %v1976_v59 = vadd.f32 %v1975_v13, %v4039_v44  ;;  %v1977_v62 = vpop.f32.mrb[21].mxu0 }
 0x834   :  { %v1978_v57 = vadd.f32 %v1977_v62, %v4044_v63  ;;  %2134 = vmatprep.mubr.f32.mxu1 %v2013_v9 }
 0x835   :  { %2135 = vmatmul.mubr.f32.gmra.mrb[18].mxu1 %v2012_v40  ;;  %v2014_v18 = vmax.f32 %v1976_v59, 0.0 }
 0x836   :  { %v3062_v51 = vpop.eup %3061  ;;  %v2015_v20 = vmax.f32 %v1978_v57, 0.0  ;;  %v1981_v23 = vpop.f32.mrb[22].mxu0 }
 0x837   :  { %v1982_v30 = vadd.f32 %v1981_v23, %v4039_v44  ;;  %v1983_v22 = vpop.f32.mrb[23].mxu0  ;;  %v1842_v25 = vmul.f32 %v3062_v51, %v3060_v2 }
 0x838   :  { %v1984_v29 = vadd.f32 %v1983_v22, %v4044_v63  ;;  %2139 = vmatprep.mubr.f32.mxu1 %v2015_v20 }
 0x839   :  { %2140 = vmatmul.mubr.f32.gmra.mrb[20].mxu1 %v2014_v18  ;;  %2004 = vmatmul.mubr.f32.gmra.mrb[30].mxu0 %v1842_v25  ;;  %v2016_v38 = vmax.f32 %v1982_v30, 0.0 }
 0x83a   :  { %v2017_v34 = vmax.f32 %v1984_v29, 0.0  ;;  %v1987_v35 = vpop.f32.mrb[24].mxu0 }
 0x83b   :  { %v1988_v42 = vadd.f32 %v1987_v35, %v4039_v44  ;;  %v1989_v47 = vpop.f32.mrb[25].mxu0 }
 0x83c   :  { %v1990_v50 = vadd.f32 %v1989_v47, %v4044_v63  ;;  %2144 = vmatprep.mubr.f32.mxu1 %v2017_v34 }
 0x83d   :  { %2145 = vmatmul.mubr.f32.gmra.mrb[22].mxu1 %v2016_v38  ;;  %v2018_v61 = vmax.f32 %v1988_v42, 0.0 }
 0x83e   :  { %v2019_v54 = vmax.f32 %v1990_v50, 0.0  ;;  %v1993_v58 = vpop.f32.mrb[26].mxu0 }
 0x83f   :  { %v1994_v1 = vadd.f32 %v1993_v58, %v4039_v44  ;;  %v1995_v5 = vpop.f32.mrb[27].mxu0 }
 0x840   :  { %v1996_v8 = vadd.f32 %v1995_v5, %v4044_v63  ;;  %2149 = vmatprep.mubr.f32.mxu1 %v2019_v54 }
 0x841   :  { %2150 = vmatmul.mubr.f32.gmra.mrb[24].mxu1 %v2018_v61  ;;  %v2020_v19 = vmax.f32 %v1994_v1, 0.0 }
 0x842   :  { %v2021_v11 = vmax.f32 %v1996_v8, 0.0  ;;  %v1999_v15 = vpop.f32.mrb[28].mxu0 }
 0x843   :  { %v2000_v24 = vadd.f32 %v1999_v15, %v4039_v44  ;;  %v2001_v28 = vpop.f32.mrb[29].mxu0 }
 0x844   :  { %v2002_v33 = vadd.f32 %v2001_v28, %v4044_v63  ;;  %2154 = vmatprep.mubr.f32.mxu1 %v2021_v11 }
 0x845   :  { %2155 = vmatmul.mubr.f32.gmra.mrb[26].mxu1 %v2020_v19  ;;  %v2022_v43 = vmax.f32 %v2000_v24, 0.0 }
 0x846   :  { %v2023_v39 = vmax.f32 %v2002_v33, 0.0 }
 0x848   :  { %2159 = vmatprep.mubr.f32.mxu1 %v2023_v39 }
 0x849   :  { %2160 = vmatmul.mubr.f32.gmra.mrb[28].mxu1 %v2022_v43 }
 0x904   :  { %v2262_v46 = vpop.f32.mrb[16].mxu1 }
 0x905   :  { %v2263_v32 = vpop.f32.mrb[17].mxu1 }
 0x906   :  { %v2264_v45 = vadd.f32 %v2263_v32, %v2262_v46 }
 0x908   :  { %v2132_v55 = vadd.f32 %v2264_v45, %v2229_v26  ;;  %v2265_v7 = vpop.f32.mrb[18].mxu1 }
 0x909   :  { %v2266_v31 = vpop.f32.mrb[19].mxu1 }
 0x90a   :  { %2170 = vst [vmem:[%s4097_s8] sm:$0xff] %v2132_v55  ;;  %v2267_v3 = vadd.f32 %v2266_v31, %v2265_v7 }
 0x90c   :  { %v2137_v14 = vadd.f32 %v2267_v3, %v2229_v26  ;;  %v2268_v16 = vpop.f32.mrb[20].mxu1  ;;  %v2005_v52 = vpop.f32.mrb[30].mxu0 }
 0x90d   :  { %v2006_v60 = vadd.f32 %v2005_v52, %v4039_v44  ;;  %v2269_v0 = vpop.f32.mrb[21].mxu1  ;;  %v2007_v37 = vpop.f32.mrb[31].mxu0 }
 0x90e   :  { %2171 = vst [vmem:[%s4097_s8 + $0x8] sm:$0xff] %v2137_v14  ;;  %v2270_v4 = vadd.f32 %v2269_v0, %v2268_v16  ;;  %v2008_v6 = vadd.f32 %v2007_v37, %v4044_v63 }
 0x90f   :  { %v2024_v27 = vmax.f32 %v2006_v60, 0.0 }
 0x910   :  { %v2142_v12 = vadd.f32 %v2270_v4, %v2229_v26  ;;  %v2025_v36 = vmax.f32 %v2008_v6, 0.0  ;;  %v2271_v41 = vpop.f32.mrb[22].mxu1 }
 0x911   :  { %v2272_v49 = vpop.f32.mrb[23].mxu1 }
 0x912   :  { %2172 = vst [vmem:[%s4097_s8 + $0x10] sm:$0xff] %v2142_v12  ;;  %v2273_v17 = vadd.f32 %v2272_v49, %v2271_v41  ;;  %2164 = vmatprep.mubr.f32.mxu1 %v2025_v36 }
 0x913   :  { %2165 = vmatmul.mubr.f32.gmra.mrb[30].mxu1 %v2024_v27 }
 0x914   :  { %v2147_v44 = vadd.f32 %v2273_v17, %v2229_v26  ;;  %v2274_v48 = vpop.f32.mrb[24].mxu1 }
 0x915   :  { %v2275_v21 = vpop.f32.mrb[25].mxu1 }
 0x916   :  { %2173 = vst [vmem:[%s4097_s8 + $0x18] sm:$0xff] %v2147_v44  ;;  %v2276_v63 = vadd.f32 %v2275_v21, %v2274_v48 }
 0x918   :  { %v2152_v10 = vadd.f32 %v2276_v63, %v2229_v26  ;;  %v2277_v53 = vpop.f32.mrb[26].mxu1 }
 0x919   :  { %v2278_v56 = vpop.f32.mrb[27].mxu1 }
 0x91a   :  { %2174 = vst [vmem:[%s4097_s8 + $0x20] sm:$0xff] %v2152_v10  ;;  %v2279_v9 = vadd.f32 %v2278_v56, %v2277_v53 }
 0x91c   :  { %v2157_v13 = vadd.f32 %v2279_v9, %v2229_v26  ;;  %v2280_v40 = vpop.f32.mrb[28].mxu1 }
 0x91d   :  { %v2281_v59 = vpop.f32.mrb[29].mxu1 }
 0x91e   :  { %2175 = vst [vmem:[%s4097_s8 + $0x28] sm:$0xff] %v2157_v13  ;;  %v2282_v62 = vadd.f32 %v2281_v59, %v2280_v40 }
 0x920   :  { %v2162_v57 = vadd.f32 %v2282_v62, %v2229_v26 }
 0x922   :  { %2176 = vst [vmem:[%s4097_s8 + $0x30] sm:$0xff] %v2162_v57 }
 0x9e6   :  { %v2283_v2 = vpop.f32.mrb[30].mxu1 }
 0x9e7   :  { %v2284_v51 = vpop.f32.mrb[31].mxu1 }
 0x9e8   :  { %v2285_v20 = vadd.f32 %v2284_v51, %v2283_v2 }
 0x9ea   :  { %v2167_v23 = vadd.f32 %v2285_v20, %v2229_v26 }
 0x9ec   :  { %2177 = vst [vmem:[%s4097_s8 + $0x38] sm:$0xff] %v2167_v23 }

</bundles_post_ra>
